<compile_context>
chip_gen: v6e
topology: v6e:2x2x1
jax: 0.10.0
libtpu: 0.0.40
codegen_flags: <defaults>
</compile_context>

<pallas_src>
import jax
import jax.numpy as jnp
from jax import lax
from jax.experimental import pallas as pl
from jax.experimental.pallas import tpu as pltpu


_NEG_BIG = -1e30
_EPS2 = 1e-24  # (1e-12)^2: torch F.normalize eps, applied to the squared norm


def _round_up(x, m):
    return ((x + m - 1) // m) * m


# ------------------------------ kernel factory ------------------------------ #
def _make_cl_loss_kernel(B_real, B_pad, TB, nsteps):
    padded = B_pad != B_real
    inv_B = 1.0 / float(B_real)

    def kernel(inv_temps_ref, s_ref, tT_ref, ids_col_ref, ids_row_ref, mask_ref,
               trep_ref, out_ref, acc_ref, col_m_ref, col_l_ref):
        stream = pl.program_id(0)   # 0 = crosslingual (text-text), 1 = crossmodal (vis-text)
        step = pl.program_id(1)     # student row-tile index

        # ------- per-stream init: column-LSE state + packed scalar accumulators -------
        @pl.when(step == 0)
        def _():
            acc_ref[...] = jnp.zeros((4, 1), jnp.float32)
            col_m_ref[...] = jnp.full((1, B_pad), _NEG_BIG, jnp.float32)
            col_l_ref[...] = jnp.zeros((1, B_pad), jnp.float32)

        inv_temp = inv_temps_ref[stream]          # clamped 1/temperature (SMEM scalar)

        # ------- student tile: fold inv-norm * inv-temp into a (TB,1) row scale -------
        s_raw = s_ref[...]                        # (TB, D) native dtype -> MXU operand
        sf = s_raw.astype(jnp.float32)
        inv_s = lax.rsqrt(jnp.maximum(jnp.sum(sf * sf, axis=-1, keepdims=True), _EPS2))
        row_scale = inv_s * inv_temp              # (TB, 1) f32

        # one matmul per stream; teacher is pre-normalized + pre-transposed in wrapper
        raw = jnp.dot(s_raw, tT_ref[0], preferred_element_type=jnp.float32)  # (TB, B_pad)
        logits = raw * row_scale

        if padded:
            col_valid = lax.broadcasted_iota(jnp.int32, (1, B_pad), 1) < B_real
            logits = jnp.where(col_valid, logits, _NEG_BIG)

        # ------- row direction (student -> teacher): logsumexp + soft positives -------
        m_row = jnp.max(logits, axis=-1, keepdims=True)
        row_lse = m_row + jnp.log(jnp.sum(jnp.exp(logits - m_row), axis=-1, keepdims=True))

        eq = ids_row_ref[0] == ids_col_ref[0]     # (TB,1)==(1,B_pad) -> (TB,B_pad) bool
        if padded:
            eq = jnp.logical_and(eq, col_valid)
        row_cnt = jnp.sum(eq.astype(jnp.float32), axis=-1, keepdims=True)
        pos = (jnp.sum(jnp.where(eq, logits, 0.0), axis=-1, keepdims=True)
               / jnp.maximum(row_cnt, 1.0))       # (TB, 1)

        if padded:
            row_valid = ((lax.broadcasted_iota(jnp.int32, (TB, 1), 0) + step * TB)
                         < B_real)
            row_lse = jnp.where(row_valid, row_lse, 0.0)
            pos = jnp.where(row_valid, pos, 0.0)
            logits_c = jnp.where(row_valid, logits, _NEG_BIG)
        else:
            logits_c = logits

        acc_ref[0:2, :] += jnp.concatenate(
            [jnp.sum(row_lse, axis=0, keepdims=True),
             jnp.sum(pos, axis=0, keepdims=True)], axis=0)

        # ------- column direction (teacher -> student): online LSE across tiles -------
        m_old = col_m_ref[...]
        l_old = col_l_ref[...]
        m_new = jnp.maximum(m_old, jnp.max(logits_c, axis=0, keepdims=True))
        col_m_ref[...] = m_new
        col_l_ref[...] = (l_old * jnp.exp(m_old - m_new)
                          + jnp.sum(jnp.exp(logits_c - m_new), axis=0, keepdims=True))

        # ------- replay MSE (memory-masked), crosslingual stream only -----------------
        @pl.when(stream == 0)
        def _():
            td = trep_ref[...].astype(jnp.float32)                    # raw teacher rows
            per = jnp.mean((sf - td) ** 2, axis=-1, keepdims=True)    # (TB, 1)
            msk = mask_ref[...]
            acc_ref[2:4, :] += jnp.concatenate(
                [jnp.sum(per * msk, axis=0, keepdims=True),
                 jnp.sum(msk, axis=0, keepdims=True)], axis=0)

        # ------- finalize this stream --------------------------------------------------
        @pl.when(step == nsteps - 1)
        def _():
            col_lse = col_m_ref[...] + jnp.log(col_l_ref[...])        # (1, B_pad)
            if padded:
                col_lse = jnp.where(col_valid, col_lse, 0.0)
            col_lse_sum = jnp.sum(col_lse, axis=-1, keepdims=True)    # (1, 1)

            row_lse_sum = acc_ref[0:1, :]
            pos_sum = acc_ref[1:2, :]
            # positive sums are shared between both CE directions (labels symmetric):
            loss = 0.5 * inv_B * (row_lse_sum + col_lse_sum - 2.0 * pos_sum)

            rep_num = acc_ref[2:3, :]
            msum = acc_ref[3:4, :]
            replay = jnp.where(msum > 0.0, rep_num / jnp.maximum(msum, 1.0), 0.0)

            vals = jnp.concatenate(
                [loss, replay, msum, jnp.zeros((5, 1), jnp.float32)], axis=0)  # (8, 1)
            out_ref[0] = jnp.broadcast_to(vals, (8, 128))

    return kernel


# --------------------------- sizing / tile selection ------------------------- #
def _vmem_capacity_bytes():
    try:
        info = pltpu.get_tpu_info()
        cap = getattr(info, "vmem_capacity_bytes", None)
        if cap:
            return int(cap)
    except Exception:
        pass
    return 64 * 1024 * 1024  # conservative (v7x per-core)


def _estimate_vmem(TB, B_pad, D, itemsize, resident_buffers):
    resident = resident_buffers * (D * B_pad * itemsize + B_pad * 4)  # teacher^T + col ids
    tiles = 2 * (TB * D * itemsize) * 2                               # student + raw-teacher tiles
    tiles += 2 * (TB * 4 + TB * 4)                                    # row ids + mask tiles
    work = 5 * TB * B_pad * 4                                         # logits + exp/select temps
    state = 2 * B_pad * 4 + 2 * 8 * 128 * 4 + 64
    return int(resident + tiles + work + state + (1 << 20))


def _choose_row_tile(B, D, itemsize, cap):
    budget = int(0.70 * cap)
    candidates = []
    if B <= 1024:
        candidates.append(_round_up(max(B, 8), 8))   # single tile for small batches
    candidates += [512, 256, 128]                    # 512 on 128MiB parts, 256/128 on v7x
    for tb in candidates:
        b_pad = _round_up(B, tb)
        if _estimate_vmem(tb, b_pad, D, itemsize, 1) <= budget:
            return tb, b_pad
    return 128, _round_up(B, 128)


# --------------------------------- wrapper ---------------------------------- #
def cl_loss_pallas(student, teacher_text, teacher_vis, vision_ids, memory_mask,
                   tt_temp, vt_temp, *,
                   crosslingual_loss_scale=1.0, crossmodal_loss_scale=1.0,
                   row_tile=None):
    B, D = student.shape
    f32 = jnp.float32
    itemsize = jnp.dtype(student.dtype).itemsize
    cap = _vmem_capacity_bytes()

    if row_tile is not None:
        assert row_tile > 0 and row_tile % 8 == 0
        TB = int(row_tile)
        B_pad = _round_up(B, TB)
    else:
        TB, B_pad = _choose_row_tile(B, D, itemsize, cap)
    nsteps = B_pad // TB
    pad = B_pad - B

    def l2_normalize(x):
        xf = x.astype(f32)
        n = jnp.maximum(jnp.sqrt(jnp.sum(xf * xf, axis=-1, keepdims=True)), 1e-12)
        return (xf / n).astype(x.dtype)

    # normalize + transpose teachers ONCE (plain XLA), stacked per stream.
    teachers_nT = jnp.stack([l2_normalize(teacher_text).T,
                             l2_normalize(teacher_vis).T], axis=0)     # (2, D, B)
    t_rep = teacher_text                                               # raw, replay MSE

    ids_tt = jnp.arange(B, dtype=jnp.int32)                            # identity positives
    ids_vt = vision_ids.reshape(-1).astype(jnp.int32)
    ids = jnp.stack([ids_tt, ids_vt], axis=0)                          # (2, B)
    mask = memory_mask.reshape(-1).astype(f32)
    student_in = student

    if pad:
        student_in = jnp.pad(student_in, ((0, pad), (0, 0)))
        teachers_nT = jnp.pad(teachers_nT, ((0, 0), (0, 0), (0, pad)))
        t_rep = jnp.pad(t_rep, ((0, pad), (0, 0)))
        ids = jnp.pad(ids, ((0, 0), (0, pad)))
        mask = jnp.pad(mask, ((0, pad),))

    ids_col = ids.reshape(2, 1, B_pad)
    ids_row = ids.reshape(2, B_pad, 1)
    mask = mask.reshape(B_pad, 1)

    # temp.clamp_(0.001, 0.5); reciprocal precomputed (scalar work, exact)
    inv_temps = 1.0 / jnp.clip(
        jnp.stack([jnp.asarray(tt_temp, f32), jnp.asarray(vt_temp, f32)]), 0.001, 0.5)

    kernel = _make_cl_loss_kernel(B, B_pad, TB, nsteps)

    def build_call(single_buffer_resident):
        resident_kwargs = (dict(pipeline_mode=pl.Buffered(1))
                           if single_buffer_resident else {})
        est = _estimate_vmem(TB, B_pad, D, itemsize, 1 if single_buffer_resident else 2)
        vmem_limit = int(min(int(0.85 * cap), max(32 * 1024 * 1024, int(1.5 * est))))
        in_specs = [
            pl.BlockSpec(memory_space=pltpu.MemorySpace.SMEM),                 # inv_temps (2,)
            pl.BlockSpec((TB, D), lambda s, i: (i, 0)),                        # student tile
            pl.BlockSpec((1, D, B_pad), lambda s, i: (s, 0, 0),
                         **resident_kwargs),                                   # teacher^T (per stream)
            pl.BlockSpec((1, 1, B_pad), lambda s, i: (s, 0, 0),
                         **resident_kwargs),                                   # column ids
            pl.BlockSpec((1, TB, 1), lambda s, i: (s, i, 0)),                  # row ids tile
            pl.BlockSpec((TB, 1), lambda s, i: (i, 0)),                        # memory mask tile
            pl.BlockSpec((TB, D), lambda s, i: (i * (1 - s), 0)),              # raw teacher tile (replay)
        ]
        return pl.pallas_call(
            kernel,
            out_shape=jax.ShapeDtypeStruct((2, 8, 128), jnp.float32),
            grid=(2, nsteps),
            in_specs=in_specs,
            out_specs=pl.BlockSpec((1, 8, 128), lambda s, i: (s, 0, 0)),
            scratch_shapes=[
                pltpu.VMEM((4, 1), jnp.float32),      # [row_lse, pos, replay_num, mask_sum]
                pltpu.VMEM((1, B_pad), jnp.float32),  # running column max
                pltpu.VMEM((1, B_pad), jnp.float32),  # running column sum-exp
            ],
            compiler_params=pltpu.CompilerParams(
                dimension_semantics=("parallel", "arbitrary"),
                vmem_limit_bytes=vmem_limit,
            ),
        )

    args = (inv_temps, student_in, teachers_nT, ids_col, ids_row, mask, t_rep)
    try:
        out = build_call(True)(*args)
    except Exception:
        # this JAX build rejects pl.Buffered(1) for the resident slabs -> default buffering
        out = build_call(False)(*args)

    tt_loss = out[0, 0, 0]
    vt_loss = out[1, 0, 0]
    replay = out[0, 1, 0]
    total = crosslingual_loss_scale * tt_loss + crossmodal_loss_scale * vt_loss + replay
    # rows: [tt_loss, vt_loss, replay_loss, total_loss]
    return jnp.stack([tt_loss, vt_loss, replay, total])


# ---------------------------- plain-JAX reference ---------------------------- #
def cl_loss_ref(student, teacher_text, teacher_vis, vision_ids, memory_mask,
                tt_temp, vt_temp, cl_scale, cm_scale):
    B = student.shape[0]

    def norm(x):
        xf = x.astype(jnp.float32)
        return xf / jnp.maximum(jnp.linalg.norm(xf, axis=-1, keepdims=True), 1e-12)

    tt_temp = jnp.clip(jnp.asarray(tt_temp, jnp.float32), 0.001, 0.5)
    vt_temp = jnp.clip(jnp.asarray(vt_temp, jnp.float32), 0.001, 0.5)
    s_n, t_n, v_n = norm(student), norm(teacher_text), norm(teacher_vis)

    idx = jnp.arange(B)

    def ce_id(l):
        return jnp.mean(jax.nn.logsumexp(l, axis=1) - l[idx, idx])

    l_st = s_n @ t_n.T / tt_temp
    l_ts = t_n @ s_n.T / tt_temp
    tt_loss = 0.5 * (ce_id(l_st) + ce_id(l_ts))

    ids = vision_ids.reshape(-1, 1)
    pos = (ids == ids.T).astype(jnp.float32)
    cl_labels = pos / pos.sum(1, keepdims=True)

    def ce_soft(l):
        return jnp.mean(-jnp.sum(jax.nn.log_softmax(l, axis=1) * cl_labels, axis=1))

    l_sv = s_n @ v_n.T / vt_temp
    l_vs = v_n @ s_n.T / vt_temp
    vt_loss = 0.5 * (ce_soft(l_sv) + ce_soft(l_vs))

    m = memory_mask.astype(jnp.float32)
    per = jnp.mean((student.astype(jnp.float32) - teacher_text.astype(jnp.float32)) ** 2,
                   axis=-1)
    replay = jnp.where(m.sum() > 0,
                       jnp.sum(per * (m / jnp.maximum(m.sum(), 1.0))), 0.0)

    total = cl_scale * tt_loss + cm_scale * vt_loss + replay
    return jnp.stack([tt_loss, vt_loss, replay, total])


# ----------------------------------- main ------------------------------------ #
if __name__ == "__main__":
    base_key = jax.random.PRNGKey(0)

    def run_case(B, D, group, row_tile=None, case=0):
        ks = jax.random.split(jax.random.fold_in(base_key, case), 4)
        student = jax.random.normal(ks[0], (B, D), dtype=jnp.float32)        # sentence_embedding
        teacher_text = jax.random.normal(ks[1], (B, D), dtype=jnp.float32)   # labels
        teacher_vis = jax.random.normal(ks[2], (B, D), dtype=jnp.float32)    # labels_ve
        vision_ids = (jnp.arange(B, dtype=jnp.int32) // group)               # duplicated image ids
        memory_mask = (jax.random.uniform(ks[3], (B,)) < 0.3).astype(jnp.int32)
        memory_mask = memory_mask.at[0].set(1)                               # replay branch active
        tt_temp = jnp.float32(0.07)                                          # init temperature
        vt_temp = jnp.float32(0.07)

        out = cl_loss_pallas(student, teacher_text, teacher_vis, vision_ids, memory_mask,
                             tt_temp, vt_temp,
                             crosslingual_loss_scale=1.0, crossmodal_loss_scale=1.0,
                             row_tile=row_tile)
        out = jax.block_until_ready(out)
        ref = cl_loss_ref(student, teacher_text, teacher_vis, vision_ids, memory_mask,
                          tt_temp, vt_temp, 1.0, 1.0)
        assert jnp.allclose(out, ref, rtol=1e-4, atol=1e-4), (B, D, row_tile, out, ref)

    run_case(B=8, D=128, group=2, case=0)                   # single-tile path
    run_case(B=24, D=128, group=3, row_tile=8, case=1)      # multi-step column-LSE carry
    run_case(B=20, D=128, group=2, row_tile=8, case=2)      # padded path (B_pad = 24)

    print("KERNEL_OK")
</pallas_src>

<mosaic_0001>
module attributes {stable_mosaic.version = 11 : i64} {
  func.func @kernel(%arg0: i32, %arg1: i32, %arg2: memref<2xf32, #tpu.memory_space<smem>>, %arg3: memref<8x128xf32, #tpu.memory_space<vmem>>, %arg4: memref<1x128x8xf32, #tpu.memory_space<vmem>>, %arg5: memref<1x1x8xi32, #tpu.memory_space<vmem>>, %arg6: memref<1x8x1xi32, #tpu.memory_space<vmem>>, %arg7: memref<8x1xf32, #tpu.memory_space<vmem>>, %arg8: memref<8x128xf32, #tpu.memory_space<vmem>>, %arg9: memref<1x8x128xf32, #tpu.memory_space<vmem>>, %arg10: memref<4x1xf32, #tpu.memory_space<vmem>>, %arg11: memref<1x8xf32, #tpu.memory_space<vmem>>, %arg12: memref<1x8xf32, #tpu.memory_space<vmem>>) attributes {dimension_semantics = [#tpu.dimension_semantics<parallel>, #tpu.dimension_semantics<arbitrary>], iteration_bounds = array<i64: 2, 1>, scalar_prefetch = 0 : i64, scratch_operands = 3 : i64, tpu.core_type = #tpu.core_type<tc>, window_params = [{transform_indices = @transform_0, window_bounds = array<i64: 2>}, {transform_indices = @transform_1, window_bounds = array<i64: 8, 128>}, {pipeline_mode = #tpu.pipeline_mode<synchronous>, transform_indices = @transform_2, window_bounds = array<i64: 1, 128, 8>}, {pipeline_mode = #tpu.pipeline_mode<synchronous>, transform_indices = @transform_3, window_bounds = array<i64: 1, 1, 8>}, {transform_indices = @transform_4, window_bounds = array<i64: 1, 8, 1>}, {transform_indices = @transform_5, window_bounds = array<i64: 8, 1>}, {transform_indices = @transform_6, window_bounds = array<i64: 8, 128>}, {transform_indices = @transform_7, window_bounds = array<i64: 1, 8, 128>}]} {
    %c0_i32 = arith.constant 0 : i32
    %0 = arith.cmpi eq, %arg1, %c0_i32 : i32
    %1 = arith.extui %0 : i1 to i32
    %c0_i32_0 = arith.constant 0 : i32
    %2 = arith.cmpi ne, %1, %c0_i32_0 : i32
    scf.if %2 {
      %cst_39 = arith.constant 0.000000e+00 : f32
      %76 = vector.broadcast %cst_39 : f32 to vector<4x1xf32>
      %c0_40 = arith.constant 0 : index
      %c0_41 = arith.constant 0 : index
      %77 = vector.load %arg10[%c0_40, %c0_41] : memref<4x1xf32, #tpu.memory_space<vmem>>, vector<4x1xf32>
      tpu.vector_store %arg10[%c0_40, %c0_41], %76 {strides = array<i32>} : memref<4x1xf32, #tpu.memory_space<vmem>>, vector<4x1xf32>,
      %cst_42 = arith.constant -1.000000e+30 : f32
      %78 = vector.broadcast %cst_42 : f32 to vector<1x8xf32>
      %c0_43 = arith.constant 0 : index
      %c0_44 = arith.constant 0 : index
      %79 = vector.load %arg11[%c0_43, %c0_44] : memref<1x8xf32, #tpu.memory_space<vmem>>, vector<1x8xf32>
      tpu.vector_store %arg11[%c0_43, %c0_44], %78 {strides = array<i32>} : memref<1x8xf32, #tpu.memory_space<vmem>>, vector<1x8xf32>,
      %cst_45 = arith.constant 0.000000e+00 : f32
      %80 = vector.broadcast %cst_45 : f32 to vector<1x8xf32>
      %c0_46 = arith.constant 0 : index
      %c0_47 = arith.constant 0 : index
      %81 = vector.load %arg12[%c0_46, %c0_47] : memref<1x8xf32, #tpu.memory_space<vmem>>, vector<1x8xf32>
      tpu.vector_store %arg12[%c0_46, %c0_47], %80 {strides = array<i32>} : memref<1x8xf32, #tpu.memory_space<vmem>>, vector<1x8xf32>,
    } else {
    }
    %3 = arith.index_cast %arg0 : i32 to index
    %4 = memref.load %arg2[%3] : memref<2xf32, #tpu.memory_space<smem>>
    %c0 = arith.constant 0 : index
    %c0_1 = arith.constant 0 : index
    %5 = vector.load %arg3[%c0, %c0_1] : memref<8x128xf32, #tpu.memory_space<vmem>>, vector<8x128xf32>
    %6 = arith.mulf %5, %5 : vector<8x128xf32>
    %cst = arith.constant dense<0.000000e+00> : vector<8xf32>
    %7 = vector.multi_reduction <add>, %6, %cst [1] : vector<8x128xf32> to vector<8xf32>
    %8 = vector.shape_cast %7 : vector<8xf32> to vector<8x1xf32>
    %cst_2 = arith.constant 1.000000e-24 : f32
    %9 = vector.broadcast %cst_2 : f32 to vector<8x1xf32>
    %10 = arith.maximumf %8, %9 : vector<8x1xf32>
    %11 = math.rsqrt %10 : vector<8x1xf32>
    %12 = vector.broadcast %4 : f32 to vector<8x1xf32>
    %13 = arith.mulf %11, %12 : vector<8x1xf32>
    %c0_3 = arith.constant 0 : index
    %c0_4 = arith.constant 0 : index
    %c0_5 = arith.constant 0 : index
    %14 = vector.load %arg4[%c0_3, %c0_4, %c0_5] : memref<1x128x8xf32, #tpu.memory_space<vmem>>, vector<1x128x8xf32>
    %15 = vector.shape_cast %14 : vector<1x128x8xf32> to vector<128x8xf32>
    %cst_6 = arith.constant dense<0.000000e+00> : vector<8x8xf32>
    %16 = tpu.matmul %5, %15, %cst_6 {dimension_numbers = #tpu.dot_dimension_numbers<[1], [0], [0], [1], [0, 0, 1, 1], [], []>} : vector<8x128xf32>, vector<128x8xf32>, vector<8x8xf32> -> vector<8x8xf32>
    %17 = vector.broadcast %13 : vector<8x1xf32> to vector<8x8xf32>
    %18 = arith.mulf %16, %17 : vector<8x8xf32>
    %cst_7 = arith.constant dense<0xFF800000> : vector<8xf32>
    %19 = vector.multi_reduction <maximumf>, %18, %cst_7 [1] : vector<8x8xf32> to vector<8xf32>
    %20 = vector.shape_cast %19 : vector<8xf32> to vector<8x1xf32>
    %21 = vector.broadcast %20 : vector<8x1xf32> to vector<8x8xf32>
    %22 = arith.subf %18, %21 : vector<8x8xf32>
    %23 = math.exp %22 : vector<8x8xf32>
    %cst_8 = arith.constant dense<0.000000e+00> : vector<8xf32>
    %24 = vector.multi_reduction <add>, %23, %cst_8 [1] : vector<8x8xf32> to vector<8xf32>
    %25 = vector.shape_cast %24 : vector<8xf32> to vector<8x1xf32>
    %26 = math.log %25 : vector<8x1xf32>
    %27 = arith.addf %20, %26 : vector<8x1xf32>
    %c0_9 = arith.constant 0 : index
    %c0_10 = arith.constant 0 : index
    %c0_11 = arith.constant 0 : index
    %28 = vector.load %arg6[%c0_9, %c0_10, %c0_11] : memref<1x8x1xi32, #tpu.memory_space<vmem>>, vector<1x8x1xi32>
    %29 = vector.shape_cast %28 : vector<1x8x1xi32> to vector<8x1xi32>
    %c0_12 = arith.constant 0 : index
    %c0_13 = arith.constant 0 : index
    %c0_14 = arith.constant 0 : index
    %30 = vector.load %arg5[%c0_12, %c0_13, %c0_14] : memref<1x1x8xi32, #tpu.memory_space<vmem>>, vector<1x1x8xi32>
    %31 = vector.shape_cast %30 : vector<1x1x8xi32> to vector<1x8xi32>
    %32 = vector.broadcast %29 : vector<8x1xi32> to vector<8x8xi32>
    %33 = vector.broadcast %31 : vector<1x8xi32> to vector<8x8xi32>
    %34 = arith.cmpi eq, %32, %33 : vector<8x8xi32>
    %35 = arith.extui %34 : vector<8x8xi1> to vector<8x8xi32>
    %36 = arith.sitofp %35 : vector<8x8xi32> to vector<8x8xf32>
    %cst_15 = arith.constant dense<0.000000e+00> : vector<8xf32>
    %37 = vector.multi_reduction <add>, %36, %cst_15 [1] : vector<8x8xf32> to vector<8xf32>
    %38 = vector.shape_cast %37 : vector<8xf32> to vector<8x1xf32>
    %cst_16 = arith.constant 0.000000e+00 : f32
    %39 = vector.broadcast %cst_16 : f32 to vector<8x8xf32>
    %40 = arith.select %34, %18, %39 : vector<8x8xi1>, vector<8x8xf32>
    %cst_17 = arith.constant dense<0.000000e+00> : vector<8xf32>
    %41 = vector.multi_reduction <add>, %40, %cst_17 [1] : vector<8x8xf32> to vector<8xf32>
    %42 = vector.shape_cast %41 : vector<8xf32> to vector<8x1xf32>
    %cst_18 = arith.constant 1.000000e+00 : f32
    %43 = vector.broadcast %cst_18 : f32 to vector<8x1xf32>
    %44 = arith.maximumf %38, %43 : vector<8x1xf32>
    %45 = arith.divf %42, %44 : vector<8x1xf32>
    %c0_19 = arith.constant 0 : index
    %c0_20 = arith.constant 0 : index
    %46 = vector.load %arg10[%c0_19, %c0_20] : memref<4x1xf32, #tpu.memory_space<vmem>>, vector<2x1xf32>
    %cst_21 = arith.constant dense<0.000000e+00> : vector<1xf32>
    %47 = vector.multi_reduction <add>, %27, %cst_21 [0] : vector<8x1xf32> to vector<1xf32>
    %48 = vector.shape_cast %47 : vector<1xf32> to vector<1x1xf32>
    %cst_22 = arith.constant dense<0.000000e+00> : vector<1xf32>
    %49 = vector.multi_reduction <add>, %45, %cst_22 [0] : vector<8x1xf32> to vector<1xf32>
    %50 = vector.shape_cast %49 : vector<1xf32> to vector<1x1xf32>
    %51 = tpu.concatenate %48, %50 in 0 : vector<1x1xf32>, vector<1x1xf32> -> vector<2x1xf32>
    %52 = arith.addf %46, %51 : vector<2x1xf32>
    %c0_23 = arith.constant 0 : index
    %c0_24 = arith.constant 0 : index
    %53 = vector.load %arg10[%c0_23, %c0_24] : memref<4x1xf32, #tpu.memory_space<vmem>>, vector<2x1xf32>
    tpu.vector_store %arg10[%c0_23, %c0_24], %52 {strides = array<i32>} : memref<4x1xf32, #tpu.memory_space<vmem>>, vector<2x1xf32>,
    %c0_25 = arith.constant 0 : index
    %c0_26 = arith.constant 0 : index
    %54 = vector.load %arg11[%c0_25, %c0_26] : memref<1x8xf32, #tpu.memory_space<vmem>>, vector<1x8xf32>
    %c0_27 = arith.constant 0 : index
    %c0_28 = arith.constant 0 : index
    %55 = vector.load %arg12[%c0_27, %c0_28] : memref<1x8xf32, #tpu.memory_space<vmem>>, vector<1x8xf32>
    %cst_29 = arith.constant dense<0xFF800000> : vector<8xf32>
    %56 = vector.multi_reduction <maximumf>, %18, %cst_29 [0] : vector<8x8xf32> to vector<8xf32>
    %57 = vector.shape_cast %56 : vector<8xf32> to vector<1x8xf32>
    %58 = arith.maximumf %54, %57 : vector<1x8xf32>
    %c0_30 = arith.constant 0 : index
    %c0_31 = arith.constant 0 : index
    %59 = vector.load %arg11[%c0_30, %c0_31] : memref<1x8xf32, #tpu.memory_space<vmem>>, vector<1x8xf32>
    tpu.vector_store %arg11[%c0_30, %c0_31], %58 {strides = array<i32>} : memref<1x8xf32, #tpu.memory_space<vmem>>, vector<1x8xf32>,
    %60 = arith.subf %54, %58 : vector<1x8xf32>
    %61 = math.exp %60 : vector<1x8xf32>
    %62 = arith.mulf %55, %61 : vector<1x8xf32>
    %63 = vector.broadcast %58 : vector<1x8xf32> to vector<8x8xf32>
    %64 = arith.subf %18, %63 : vector<8x8xf32>
    %65 = math.exp %64 : vector<8x8xf32>
    %cst_32 = arith.constant dense<0.000000e+00> : vector<8xf32>
    %66 = vector.multi_reduction <add>, %65, %cst_32 [0] : vector<8x8xf32> to vector<8xf32>
    %67 = vector.shape_cast %66 : vector<8xf32> to vector<1x8xf32>
    %68 = arith.addf %62, %67 : vector<1x8xf32>
    %c0_33 = arith.constant 0 : index
    %c0_34 = arith.constant 0 : index
    %69 = vector.load %arg12[%c0_33, %c0_34] : memref<1x8xf32, #tpu.memory_space<vmem>>, vector<1x8xf32>
    tpu.vector_store %arg12[%c0_33, %c0_34], %68 {strides = array<i32>} : memref<1x8xf32, #tpu.memory_space<vmem>>, vector<1x8xf32>,
    %c0_i32_35 = arith.constant 0 : i32
    %70 = arith.cmpi eq, %arg0, %c0_i32_35 : i32
    %71 = arith.extui %70 : i1 to i32
    %c0_i32_36 = arith.constant 0 : i32
    %72 = arith.cmpi ne, %71, %c0_i32_36 : i32
    scf.if %72 {
      %c0_39 = arith.constant 0 : index
      %c0_40 = arith.constant 0 : index
      %76 = vector.load %arg8[%c0_39, %c0_40] : memref<8x128xf32, #tpu.memory_space<vmem>>, vector<8x128xf32>
      %77 = arith.subf %5, %76 : vector<8x128xf32>
      %78 = arith.mulf %77, %77 : vector<8x128xf32>
      %cst_41 = arith.constant dense<0.000000e+00> : vector<8xf32>
      %79 = vector.multi_reduction <add>, %78, %cst_41 [1] : vector<8x128xf32> to vector<8xf32>
      %80 = vector.shape_cast %79 : vector<8xf32> to vector<8x1xf32>
      %cst_42 = arith.constant 1.280000e+02 : f32
      %81 = vector.broadcast %cst_42 : f32 to vector<8x1xf32>
      %82 = arith.divf %80, %81 : vector<8x1xf32>
      %c0_43 = arith.constant 0 : index
      %c0_44 = arith.constant 0 : index
      %83 = vector.load %arg7[%c0_43, %c0_44] : memref<8x1xf32, #tpu.memory_space<vmem>>, vector<8x1xf32>
      %c2 = arith.constant 2 : index
      %c0_45 = arith.constant 0 : index
      %84 = vector.load %arg10[%c2, %c0_45] : memref<4x1xf32, #tpu.memory_space<vmem>>, vector<2x1xf32>
      %85 = arith.mulf %82, %83 : vector<8x1xf32>
      %cst_46 = arith.constant dense<0.000000e+00> : vector<1xf32>
      %86 = vector.multi_reduction <add>, %85, %cst_46 [0] : vector<8x1xf32> to vector<1xf32>
      %87 = vector.shape_cast %86 : vector<1xf32> to vector<1x1xf32>
      %cst_47 = arith.constant dense<0.000000e+00> : vector<1xf32>
      %88 = vector.multi_reduction <add>, %83, %cst_47 [0] : vector<8x1xf32> to vector<1xf32>
      %89 = vector.shape_cast %88 : vector<1xf32> to vector<1x1xf32>
      %90 = tpu.concatenate %87, %89 in 0 : vector<1x1xf32>, vector<1x1xf32> -> vector<2x1xf32>
      %91 = arith.addf %84, %90 : vector<2x1xf32>
      %c2_48 = arith.constant 2 : index
      %c0_49 = arith.constant 0 : index
      %92 = vector.load %arg10[%c2_48, %c0_49] : memref<4x1xf32, #tpu.memory_space<vmem>>, vector<2x1xf32>
      tpu.vector_store %arg10[%c2_48, %c0_49], %91 {strides = array<i32>} : memref<4x1xf32, #tpu.memory_space<vmem>>, vector<2x1xf32>,
    } else {
    }
    %c0_i32_37 = arith.constant 0 : i32
    %73 = arith.cmpi eq, %arg1, %c0_i32_37 : i32
    %74 = arith.extui %73 : i1 to i32
    %c0_i32_38 = arith.constant 0 : i32
    %75 = arith.cmpi ne, %74, %c0_i32_38 : i32
    scf.if %75 {
      %c0_39 = arith.constant 0 : index
      %c0_40 = arith.constant 0 : index
      %76 = vector.load %arg11[%c0_39, %c0_40] : memref<1x8xf32, #tpu.memory_space<vmem>>, vector<1x8xf32>
      %c0_41 = arith.constant 0 : index
      %c0_42 = arith.constant 0 : index
      %77 = vector.load %arg12[%c0_41, %c0_42] : memref<1x8xf32, #tpu.memory_space<vmem>>, vector<1x8xf32>
      %78 = math.log %77 : vector<1x8xf32>
      %79 = arith.addf %76, %78 : vector<1x8xf32>
      %cst_43 = arith.constant dense<0.000000e+00> : vector<1xf32>
      %80 = vector.multi_reduction <add>, %79, %cst_43 [1] : vector<1x8xf32> to vector<1xf32>
      %81 = vector.shape_cast %80 : vector<1xf32> to vector<1x1xf32>
      %c0_44 = arith.constant 0 : index
      %c0_45 = arith.constant 0 : index
      %82 = vector.load %arg10[%c0_44, %c0_45] : memref<4x1xf32, #tpu.memory_space<vmem>>, vector<1x1xf32>
      %c1 = arith.constant 1 : index
      %c0_46 = arith.constant 0 : index
      %83 = vector.load %arg10[%c1, %c0_46] : memref<4x1xf32, #tpu.memory_space<vmem>>, vector<1x1xf32>
      %84 = arith.addf %82, %81 : vector<1x1xf32>
      %cst_47 = arith.constant 2.000000e+00 : f32
      %85 = vector.broadcast %cst_47 : f32 to vector<1x1xf32>
      %86 = arith.mulf %85, %83 : vector<1x1xf32>
      %87 = arith.subf %84, %86 : vector<1x1xf32>
      %cst_48 = arith.constant 6.250000e-02 : f32
      %88 = vector.broadcast %cst_48 : f32 to vector<1x1xf32>
      %89 = arith.mulf %88, %87 : vector<1x1xf32>
      %c2 = arith.constant 2 : index
      %c0_49 = arith.constant 0 : index
      %90 = vector.load %arg10[%c2, %c0_49] : memref<4x1xf32, #tpu.memory_space<vmem>>, vector<1x1xf32>
      %c3 = arith.constant 3 : index
      %c0_50 = arith.constant 0 : index
      %91 = vector.load %arg10[%c3, %c0_50] : memref<4x1xf32, #tpu.memory_space<vmem>>, vector<1x1xf32>
      %cst_51 = arith.constant 0.000000e+00 : f32
      %92 = vector.broadcast %cst_51 : f32 to vector<1x1xf32>
      %93 = arith.cmpf ogt, %91, %92 : vector<1x1xf32>
      %cst_52 = arith.constant 1.000000e+00 : f32
      %94 = vector.broadcast %cst_52 : f32 to vector<1x1xf32>
      %95 = arith.maximumf %91, %94 : vector<1x1xf32>
      %96 = arith.divf %90, %95 : vector<1x1xf32>
      %cst_53 = arith.constant 0.000000e+00 : f32
      %97 = vector.broadcast %cst_53 : f32 to vector<1x1xf32>
      %98 = arith.select %93, %96, %97 : vector<1x1xi1>, vector<1x1xf32>
      %cst_54 = arith.constant 0.000000e+00 : f32
      %99 = vector.broadcast %cst_54 : f32 to vector<5x1xf32>
      %100 = tpu.concatenate %89, %98, %91, %99 in 0 : vector<1x1xf32>, vector<1x1xf32>, vector<1x1xf32>, vector<5x1xf32> -> vector<8x1xf32>
      %101 = vector.shape_cast %100 : vector<8x1xf32> to vector<8x1xf32>
      %102 = vector.broadcast %101 : vector<8x1xf32> to vector<8x128xf32>
      %c0_55 = arith.constant 0 : index
      %c0_56 = arith.constant 0 : index
      %c0_57 = arith.constant 0 : index
      %103 = vector.load %arg9[%c0_55, %c0_56, %c0_57] : memref<1x8x128xf32, #tpu.memory_space<vmem>>, vector<1x8x128xf32>
      %104 = vector.shape_cast %103 : vector<1x8x128xf32> to vector<8x128xf32>
      %105 = vector.shape_cast %102 : vector<8x128xf32> to vector<1x8x128xf32>
      tpu.vector_store %arg9[%c0_55, %c0_56, %c0_57], %105 {strides = array<i32>} : memref<1x8x128xf32, #tpu.memory_space<vmem>>, vector<1x8x128xf32>,
    } else {
    }
    return
  }
  func.func @transform_0(%arg0: i32, %arg1: i32) -> i32 {
    %c0_i32 = arith.constant 0 : i32
    %c0_i32_0 = arith.constant 0 : i32
    return %c0_i32 : i32
  }
  func.func @transform_1(%arg0: i32, %arg1: i32) -> (i32, i32) {
    %c0_i32 = arith.constant 0 : i32
    %c0_i32_0 = arith.constant 0 : i32
    return %arg1, %c0_i32 : i32, i32
  }
  func.func @transform_2(%arg0: i32, %arg1: i32) -> (i32, i32, i32) {
    %c0_i32 = arith.constant 0 : i32
    %c0_i32_0 = arith.constant 0 : i32
    %c0_i32_1 = arith.constant 0 : i32
    return %arg0, %c0_i32, %c0_i32_0 : i32, i32, i32
  }
  func.func @transform_3(%arg0: i32, %arg1: i32) -> (i32, i32, i32) {
    %c0_i32 = arith.constant 0 : i32
    %c0_i32_0 = arith.constant 0 : i32
    %c0_i32_1 = arith.constant 0 : i32
    return %arg0, %c0_i32, %c0_i32_0 : i32, i32, i32
  }
  func.func @transform_4(%arg0: i32, %arg1: i32) -> (i32, i32, i32) {
    %c0_i32 = arith.constant 0 : i32
    %c0_i32_0 = arith.constant 0 : i32
    return %arg0, %arg1, %c0_i32 : i32, i32, i32
  }
  func.func @transform_5(%arg0: i32, %arg1: i32) -> (i32, i32) {
    %c0_i32 = arith.constant 0 : i32
    %c0_i32_0 = arith.constant 0 : i32
    return %arg1, %c0_i32 : i32, i32
  }
  func.func @transform_6(%arg0: i32, %arg1: i32) -> (i32, i32) {
    %c1_i32 = arith.constant 1 : i32
    %0 = arith.subi %c1_i32, %arg0 : i32
    %1 = arith.muli %arg1, %0 : i32
    %c0_i32 = arith.constant 0 : i32
    %c0_i32_0 = arith.constant 0 : i32
    return %1, %c0_i32 : i32, i32
  }
  func.func @transform_7(%arg0: i32, %arg1: i32) -> (i32, i32, i32) {
    %c0_i32 = arith.constant 0 : i32
    %c0_i32_0 = arith.constant 0 : i32
    %c0_i32_1 = arith.constant 0 : i32
    return %arg0, %c0_i32, %c0_i32_0 : i32, i32, i32
  }
}

module attributes {stable_mosaic.version = 11 : i64} {
  func.func @kernel(%arg0: i32, %arg1: i32, %arg2: memref<2xf32, #tpu.memory_space<smem>>, %arg3: memref<8x128xf32, #tpu.memory_space<vmem>>, %arg4: memref<1x128x8xf32, #tpu.memory_space<vmem>>, %arg5: memref<1x1x8xi32, #tpu.memory_space<vmem>>, %arg6: memref<1x8x1xi32, #tpu.memory_space<vmem>>, %arg7: memref<8x1xf32, #tpu.memory_space<vmem>>, %arg8: memref<8x128xf32, #tpu.memory_space<vmem>>, %arg9: memref<1x8x128xf32, #tpu.memory_space<vmem>>, %arg10: memref<4x1xf32, #tpu.memory_space<vmem>>, %arg11: memref<1x8xf32, #tpu.memory_space<vmem>>, %arg12: memref<1x8xf32, #tpu.memory_space<vmem>>) attributes {dimension_semantics = [#tpu.dimension_semantics<parallel>, #tpu.dimension_semantics<arbitrary>], iteration_bounds = array<i64: 2, 1>, scalar_prefetch = 0 : i64, scratch_operands = 3 : i64, tpu.core_type = #tpu.core_type<tc>, window_params = [{transform_indices = @transform_0, window_bounds = array<i64: 2>}, {transform_indices = @transform_1, window_bounds = array<i64: 8, 128>}, {transform_indices = @transform_2, window_bounds = array<i64: 1, 128, 8>}, {transform_indices = @transform_3, window_bounds = array<i64: 1, 1, 8>}, {transform_indices = @transform_4, window_bounds = array<i64: 1, 8, 1>}, {transform_indices = @transform_5, window_bounds = array<i64: 8, 1>}, {transform_indices = @transform_6, window_bounds = array<i64: 8, 128>}, {transform_indices = @transform_7, window_bounds = array<i64: 1, 8, 128>}]} {
    %c0_i32 = arith.constant 0 : i32
    %0 = arith.cmpi eq, %arg1, %c0_i32 : i32
    %1 = arith.extui %0 : i1 to i32
    %c0_i32_0 = arith.constant 0 : i32
    %2 = arith.cmpi ne, %1, %c0_i32_0 : i32
    scf.if %2 {
      %cst_39 = arith.constant 0.000000e+00 : f32
      %76 = vector.broadcast %cst_39 : f32 to vector<4x1xf32>
      %c0_40 = arith.constant 0 : index
      %c0_41 = arith.constant 0 : index
      %77 = vector.load %arg10[%c0_40, %c0_41] : memref<4x1xf32, #tpu.memory_space<vmem>>, vector<4x1xf32>
      tpu.vector_store %arg10[%c0_40, %c0_41], %76 {strides = array<i32>} : memref<4x1xf32, #tpu.memory_space<vmem>>, vector<4x1xf32>,
      %cst_42 = arith.constant -1.000000e+30 : f32
      %78 = vector.broadcast %cst_42 : f32 to vector<1x8xf32>
      %c0_43 = arith.constant 0 : index
      %c0_44 = arith.constant 0 : index
      %79 = vector.load %arg11[%c0_43, %c0_44] : memref<1x8xf32, #tpu.memory_space<vmem>>, vector<1x8xf32>
      tpu.vector_store %arg11[%c0_43, %c0_44], %78 {strides = array<i32>} : memref<1x8xf32, #tpu.memory_space<vmem>>, vector<1x8xf32>,
      %cst_45 = arith.constant 0.000000e+00 : f32
      %80 = vector.broadcast %cst_45 : f32 to vector<1x8xf32>
      %c0_46 = arith.constant 0 : index
      %c0_47 = arith.constant 0 : index
      %81 = vector.load %arg12[%c0_46, %c0_47] : memref<1x8xf32, #tpu.memory_space<vmem>>, vector<1x8xf32>
      tpu.vector_store %arg12[%c0_46, %c0_47], %80 {strides = array<i32>} : memref<1x8xf32, #tpu.memory_space<vmem>>, vector<1x8xf32>,
    } else {
    }
    %3 = arith.index_cast %arg0 : i32 to index
    %4 = memref.load %arg2[%3] : memref<2xf32, #tpu.memory_space<smem>>
    %c0 = arith.constant 0 : index
    %c0_1 = arith.constant 0 : index
    %5 = vector.load %arg3[%c0, %c0_1] : memref<8x128xf32, #tpu.memory_space<vmem>>, vector<8x128xf32>
    %6 = arith.mulf %5, %5 : vector<8x128xf32>
    %cst = arith.constant dense<0.000000e+00> : vector<8xf32>
    %7 = vector.multi_reduction <add>, %6, %cst [1] : vector<8x128xf32> to vector<8xf32>
    %8 = vector.shape_cast %7 : vector<8xf32> to vector<8x1xf32>
    %cst_2 = arith.constant 1.000000e-24 : f32
    %9 = vector.broadcast %cst_2 : f32 to vector<8x1xf32>
    %10 = arith.maximumf %8, %9 : vector<8x1xf32>
    %11 = math.rsqrt %10 : vector<8x1xf32>
    %12 = vector.broadcast %4 : f32 to vector<8x1xf32>
    %13 = arith.mulf %11, %12 : vector<8x1xf32>
    %c0_3 = arith.constant 0 : index
    %c0_4 = arith.constant 0 : index
    %c0_5 = arith.constant 0 : index
    %14 = vector.load %arg4[%c0_3, %c0_4, %c0_5] : memref<1x128x8xf32, #tpu.memory_space<vmem>>, vector<1x128x8xf32>
    %15 = vector.shape_cast %14 : vector<1x128x8xf32> to vector<128x8xf32>
    %cst_6 = arith.constant dense<0.000000e+00> : vector<8x8xf32>
    %16 = tpu.matmul %5, %15, %cst_6 {dimension_numbers = #tpu.dot_dimension_numbers<[1], [0], [0], [1], [0, 0, 1, 1], [], []>} : vector<8x128xf32>, vector<128x8xf32>, vector<8x8xf32> -> vector<8x8xf32>
    %17 = vector.broadcast %13 : vector<8x1xf32> to vector<8x8xf32>
    %18 = arith.mulf %16, %17 : vector<8x8xf32>
    %cst_7 = arith.constant dense<0xFF800000> : vector<8xf32>
    %19 = vector.multi_reduction <maximumf>, %18, %cst_7 [1] : vector<8x8xf32> to vector<8xf32>
    %20 = vector.shape_cast %19 : vector<8xf32> to vector<8x1xf32>
    %21 = vector.broadcast %20 : vector<8x1xf32> to vector<8x8xf32>
    %22 = arith.subf %18, %21 : vector<8x8xf32>
    %23 = math.exp %22 : vector<8x8xf32>
    %cst_8 = arith.constant dense<0.000000e+00> : vector<8xf32>
    %24 = vector.multi_reduction <add>, %23, %cst_8 [1] : vector<8x8xf32> to vector<8xf32>
    %25 = vector.shape_cast %24 : vector<8xf32> to vector<8x1xf32>
    %26 = math.log %25 : vector<8x1xf32>
    %27 = arith.addf %20, %26 : vector<8x1xf32>
    %c0_9 = arith.constant 0 : index
    %c0_10 = arith.constant 0 : index
    %c0_11 = arith.constant 0 : index
    %28 = vector.load %arg6[%c0_9, %c0_10, %c0_11] : memref<1x8x1xi32, #tpu.memory_space<vmem>>, vector<1x8x1xi32>
    %29 = vector.shape_cast %28 : vector<1x8x1xi32> to vector<8x1xi32>
    %c0_12 = arith.constant 0 : index
    %c0_13 = arith.constant 0 : index
    %c0_14 = arith.constant 0 : index
    %30 = vector.load %arg5[%c0_12, %c0_13, %c0_14] : memref<1x1x8xi32, #tpu.memory_space<vmem>>, vector<1x1x8xi32>
    %31 = vector.shape_cast %30 : vector<1x1x8xi32> to vector<1x8xi32>
    %32 = vector.broadcast %29 : vector<8x1xi32> to vector<8x8xi32>
    %33 = vector.broadcast %31 : vector<1x8xi32> to vector<8x8xi32>
    %34 = arith.cmpi eq, %32, %33 : vector<8x8xi32>
    %35 = arith.extui %34 : vector<8x8xi1> to vector<8x8xi32>
    %36 = arith.sitofp %35 : vector<8x8xi32> to vector<8x8xf32>
    %cst_15 = arith.constant dense<0.000000e+00> : vector<8xf32>
    %37 = vector.multi_reduction <add>, %36, %cst_15 [1] : vector<8x8xf32> to vector<8xf32>
    %38 = vector.shape_cast %37 : vector<8xf32> to vector<8x1xf32>
    %cst_16 = arith.constant 0.000000e+00 : f32
    %39 = vector.broadcast %cst_16 : f32 to vector<8x8xf32>
    %40 = arith.select %34, %18, %39 : vector<8x8xi1>, vector<8x8xf32>
    %cst_17 = arith.constant dense<0.000000e+00> : vector<8xf32>
    %41 = vector.multi_reduction <add>, %40, %cst_17 [1] : vector<8x8xf32> to vector<8xf32>
    %42 = vector.shape_cast %41 : vector<8xf32> to vector<8x1xf32>
    %cst_18 = arith.constant 1.000000e+00 : f32
    %43 = vector.broadcast %cst_18 : f32 to vector<8x1xf32>
    %44 = arith.maximumf %38, %43 : vector<8x1xf32>
    %45 = arith.divf %42, %44 : vector<8x1xf32>
    %c0_19 = arith.constant 0 : index
    %c0_20 = arith.constant 0 : index
    %46 = vector.load %arg10[%c0_19, %c0_20] : memref<4x1xf32, #tpu.memory_space<vmem>>, vector<2x1xf32>
    %cst_21 = arith.constant dense<0.000000e+00> : vector<1xf32>
    %47 = vector.multi_reduction <add>, %27, %cst_21 [0] : vector<8x1xf32> to vector<1xf32>
    %48 = vector.shape_cast %47 : vector<1xf32> to vector<1x1xf32>
    %cst_22 = arith.constant dense<0.000000e+00> : vector<1xf32>
    %49 = vector.multi_reduction <add>, %45, %cst_22 [0] : vector<8x1xf32> to vector<1xf32>
    %50 = vector.shape_cast %49 : vector<1xf32> to vector<1x1xf32>
    %51 = tpu.concatenate %48, %50 in 0 : vector<1x1xf32>, vector<1x1xf32> -> vector<2x1xf32>
    %52 = arith.addf %46, %51 : vector<2x1xf32>
    %c0_23 = arith.constant 0 : index
    %c0_24 = arith.constant 0 : index
    %53 = vector.load %arg10[%c0_23, %c0_24] : memref<4x1xf32, #tpu.memory_space<vmem>>, vector<2x1xf32>
    tpu.vector_store %arg10[%c0_23, %c0_24], %52 {strides = array<i32>} : memref<4x1xf32, #tpu.memory_space<vmem>>, vector<2x1xf32>,
    %c0_25 = arith.constant 0 : index
    %c0_26 = arith.constant 0 : index
    %54 = vector.load %arg11[%c0_25, %c0_26] : memref<1x8xf32, #tpu.memory_space<vmem>>, vector<1x8xf32>
    %c0_27 = arith.constant 0 : index
    %c0_28 = arith.constant 0 : index
    %55 = vector.load %arg12[%c0_27, %c0_28] : memref<1x8xf32, #tpu.memory_space<vmem>>, vector<1x8xf32>
    %cst_29 = arith.constant dense<0xFF800000> : vector<8xf32>
    %56 = vector.multi_reduction <maximumf>, %18, %cst_29 [0] : vector<8x8xf32> to vector<8xf32>
    %57 = vector.shape_cast %56 : vector<8xf32> to vector<1x8xf32>
    %58 = arith.maximumf %54, %57 : vector<1x8xf32>
    %c0_30 = arith.constant 0 : index
    %c0_31 = arith.constant 0 : index
    %59 = vector.load %arg11[%c0_30, %c0_31] : memref<1x8xf32, #tpu.memory_space<vmem>>, vector<1x8xf32>
    tpu.vector_store %arg11[%c0_30, %c0_31], %58 {strides = array<i32>} : memref<1x8xf32, #tpu.memory_space<vmem>>, vector<1x8xf32>,
    %60 = arith.subf %54, %58 : vector<1x8xf32>
    %61 = math.exp %60 : vector<1x8xf32>
    %62 = arith.mulf %55, %61 : vector<1x8xf32>
    %63 = vector.broadcast %58 : vector<1x8xf32> to vector<8x8xf32>
    %64 = arith.subf %18, %63 : vector<8x8xf32>
    %65 = math.exp %64 : vector<8x8xf32>
    %cst_32 = arith.constant dense<0.000000e+00> : vector<8xf32>
    %66 = vector.multi_reduction <add>, %65, %cst_32 [0] : vector<8x8xf32> to vector<8xf32>
    %67 = vector.shape_cast %66 : vector<8xf32> to vector<1x8xf32>
    %68 = arith.addf %62, %67 : vector<1x8xf32>
    %c0_33 = arith.constant 0 : index
    %c0_34 = arith.constant 0 : index
    %69 = vector.load %arg12[%c0_33, %c0_34] : memref<1x8xf32, #tpu.memory_space<vmem>>, vector<1x8xf32>
    tpu.vector_store %arg12[%c0_33, %c0_34], %68 {strides = array<i32>} : memref<1x8xf32, #tpu.memory_space<vmem>>, vector<1x8xf32>,
    %c0_i32_35 = arith.constant 0 : i32
    %70 = arith.cmpi eq, %arg0, %c0_i32_35 : i32
    %71 = arith.extui %70 : i1 to i32
    %c0_i32_36 = arith.constant 0 : i32
    %72 = arith.cmpi ne, %71, %c0_i32_36 : i32
    scf.if %72 {
      %c0_39 = arith.constant 0 : index
      %c0_40 = arith.constant 0 : index
      %76 = vector.load %arg8[%c0_39, %c0_40] : memref<8x128xf32, #tpu.memory_space<vmem>>, vector<8x128xf32>
      %77 = arith.subf %5, %76 : vector<8x128xf32>
      %78 = arith.mulf %77, %77 : vector<8x128xf32>
      %cst_41 = arith.constant dense<0.000000e+00> : vector<8xf32>
      %79 = vector.multi_reduction <add>, %78, %cst_41 [1] : vector<8x128xf32> to vector<8xf32>
      %80 = vector.shape_cast %79 : vector<8xf32> to vector<8x1xf32>
      %cst_42 = arith.constant 1.280000e+02 : f32
      %81 = vector.broadcast %cst_42 : f32 to vector<8x1xf32>
      %82 = arith.divf %80, %81 : vector<8x1xf32>
      %c0_43 = arith.constant 0 : index
      %c0_44 = arith.constant 0 : index
      %83 = vector.load %arg7[%c0_43, %c0_44] : memref<8x1xf32, #tpu.memory_space<vmem>>, vector<8x1xf32>
      %c2 = arith.constant 2 : index
      %c0_45 = arith.constant 0 : index
      %84 = vector.load %arg10[%c2, %c0_45] : memref<4x1xf32, #tpu.memory_space<vmem>>, vector<2x1xf32>
      %85 = arith.mulf %82, %83 : vector<8x1xf32>
      %cst_46 = arith.constant dense<0.000000e+00> : vector<1xf32>
      %86 = vector.multi_reduction <add>, %85, %cst_46 [0] : vector<8x1xf32> to vector<1xf32>
      %87 = vector.shape_cast %86 : vector<1xf32> to vector<1x1xf32>
      %cst_47 = arith.constant dense<0.000000e+00> : vector<1xf32>
      %88 = vector.multi_reduction <add>, %83, %cst_47 [0] : vector<8x1xf32> to vector<1xf32>
      %89 = vector.shape_cast %88 : vector<1xf32> to vector<1x1xf32>
      %90 = tpu.concatenate %87, %89 in 0 : vector<1x1xf32>, vector<1x1xf32> -> vector<2x1xf32>
      %91 = arith.addf %84, %90 : vector<2x1xf32>
      %c2_48 = arith.constant 2 : index
      %c0_49 = arith.constant 0 : index
      %92 = vector.load %arg10[%c2_48, %c0_49] : memref<4x1xf32, #tpu.memory_space<vmem>>, vector<2x1xf32>
      tpu.vector_store %arg10[%c2_48, %c0_49], %91 {strides = array<i32>} : memref<4x1xf32, #tpu.memory_space<vmem>>, vector<2x1xf32>,
    } else {
    }
    %c0_i32_37 = arith.constant 0 : i32
    %73 = arith.cmpi eq, %arg1, %c0_i32_37 : i32
    %74 = arith.extui %73 : i1 to i32
    %c0_i32_38 = arith.constant 0 : i32
    %75 = arith.cmpi ne, %74, %c0_i32_38 : i32
    scf.if %75 {
      %c0_39 = arith.constant 0 : index
      %c0_40 = arith.constant 0 : index
      %76 = vector.load %arg11[%c0_39, %c0_40] : memref<1x8xf32, #tpu.memory_space<vmem>>, vector<1x8xf32>
      %c0_41 = arith.constant 0 : index
      %c0_42 = arith.constant 0 : index
      %77 = vector.load %arg12[%c0_41, %c0_42] : memref<1x8xf32, #tpu.memory_space<vmem>>, vector<1x8xf32>
      %78 = math.log %77 : vector<1x8xf32>
      %79 = arith.addf %76, %78 : vector<1x8xf32>
      %cst_43 = arith.constant dense<0.000000e+00> : vector<1xf32>
      %80 = vector.multi_reduction <add>, %79, %cst_43 [1] : vector<1x8xf32> to vector<1xf32>
      %81 = vector.shape_cast %80 : vector<1xf32> to vector<1x1xf32>
      %c0_44 = arith.constant 0 : index
      %c0_45 = arith.constant 0 : index
      %82 = vector.load %arg10[%c0_44, %c0_45] : memref<4x1xf32, #tpu.memory_space<vmem>>, vector<1x1xf32>
      %c1 = arith.constant 1 : index
      %c0_46 = arith.constant 0 : index
      %83 = vector.load %arg10[%c1, %c0_46] : memref<4x1xf32, #tpu.memory_space<vmem>>, vector<1x1xf32>
      %84 = arith.addf %82, %81 : vector<1x1xf32>
      %cst_47 = arith.constant 2.000000e+00 : f32
      %85 = vector.broadcast %cst_47 : f32 to vector<1x1xf32>
      %86 = arith.mulf %85, %83 : vector<1x1xf32>
      %87 = arith.subf %84, %86 : vector<1x1xf32>
      %cst_48 = arith.constant 6.250000e-02 : f32
      %88 = vector.broadcast %cst_48 : f32 to vector<1x1xf32>
      %89 = arith.mulf %88, %87 : vector<1x1xf32>
      %c2 = arith.constant 2 : index
      %c0_49 = arith.constant 0 : index
      %90 = vector.load %arg10[%c2, %c0_49] : memref<4x1xf32, #tpu.memory_space<vmem>>, vector<1x1xf32>
      %c3 = arith.constant 3 : index
      %c0_50 = arith.constant 0 : index
      %91 = vector.load %arg10[%c3, %c0_50] : memref<4x1xf32, #tpu.memory_space<vmem>>, vector<1x1xf32>
      %cst_51 = arith.constant 0.000000e+00 : f32
      %92 = vector.broadcast %cst_51 : f32 to vector<1x1xf32>
      %93 = arith.cmpf ogt, %91, %92 : vector<1x1xf32>
      %cst_52 = arith.constant 1.000000e+00 : f32
      %94 = vector.broadcast %cst_52 : f32 to vector<1x1xf32>
      %95 = arith.maximumf %91, %94 : vector<1x1xf32>
      %96 = arith.divf %90, %95 : vector<1x1xf32>
      %cst_53 = arith.constant 0.000000e+00 : f32
      %97 = vector.broadcast %cst_53 : f32 to vector<1x1xf32>
      %98 = arith.select %93, %96, %97 : vector<1x1xi1>, vector<1x1xf32>
      %cst_54 = arith.constant 0.000000e+00 : f32
      %99 = vector.broadcast %cst_54 : f32 to vector<5x1xf32>
      %100 = tpu.concatenate %89, %98, %91, %99 in 0 : vector<1x1xf32>, vector<1x1xf32>, vector<1x1xf32>, vector<5x1xf32> -> vector<8x1xf32>
      %101 = vector.shape_cast %100 : vector<8x1xf32> to vector<8x1xf32>
      %102 = vector.broadcast %101 : vector<8x1xf32> to vector<8x128xf32>
      %c0_55 = arith.constant 0 : index
      %c0_56 = arith.constant 0 : index
      %c0_57 = arith.constant 0 : index
      %103 = vector.load %arg9[%c0_55, %c0_56, %c0_57] : memref<1x8x128xf32, #tpu.memory_space<vmem>>, vector<1x8x128xf32>
      %104 = vector.shape_cast %103 : vector<1x8x128xf32> to vector<8x128xf32>
      %105 = vector.shape_cast %102 : vector<8x128xf32> to vector<1x8x128xf32>
      tpu.vector_store %arg9[%c0_55, %c0_56, %c0_57], %105 {strides = array<i32>} : memref<1x8x128xf32, #tpu.memory_space<vmem>>, vector<1x8x128xf32>,
    } else {
    }
    return
  }
  func.func @transform_0(%arg0: i32, %arg1: i32) -> i32 {
    %c0_i32 = arith.constant 0 : i32
    %c0_i32_0 = arith.constant 0 : i32
    return %c0_i32 : i32
  }
  func.func @transform_1(%arg0: i32, %arg1: i32) -> (i32, i32) {
    %c0_i32 = arith.constant 0 : i32
    %c0_i32_0 = arith.constant 0 : i32
    return %arg1, %c0_i32 : i32, i32
  }
  func.func @transform_2(%arg0: i32, %arg1: i32) -> (i32, i32, i32) {
    %c0_i32 = arith.constant 0 : i32
    %c0_i32_0 = arith.constant 0 : i32
    %c0_i32_1 = arith.constant 0 : i32
    return %arg0, %c0_i32, %c0_i32_0 : i32, i32, i32
  }
  func.func @transform_3(%arg0: i32, %arg1: i32) -> (i32, i32, i32) {
    %c0_i32 = arith.constant 0 : i32
    %c0_i32_0 = arith.constant 0 : i32
    %c0_i32_1 = arith.constant 0 : i32
    return %arg0, %c0_i32, %c0_i32_0 : i32, i32, i32
  }
  func.func @transform_4(%arg0: i32, %arg1: i32) -> (i32, i32, i32) {
    %c0_i32 = arith.constant 0 : i32
    %c0_i32_0 = arith.constant 0 : i32
    return %arg0, %arg1, %c0_i32 : i32, i32, i32
  }
  func.func @transform_5(%arg0: i32, %arg1: i32) -> (i32, i32) {
    %c0_i32 = arith.constant 0 : i32
    %c0_i32_0 = arith.constant 0 : i32
    return %arg1, %c0_i32 : i32, i32
  }
  func.func @transform_6(%arg0: i32, %arg1: i32) -> (i32, i32) {
    %c1_i32 = arith.constant 1 : i32
    %0 = arith.subi %c1_i32, %arg0 : i32
    %1 = arith.muli %arg1, %0 : i32
    %c0_i32 = arith.constant 0 : i32
    %c0_i32_0 = arith.constant 0 : i32
    return %1, %c0_i32 : i32, i32
  }
  func.func @transform_7(%arg0: i32, %arg1: i32) -> (i32, i32, i32) {
    %c0_i32 = arith.constant 0 : i32
    %c0_i32_0 = arith.constant 0 : i32
    %c0_i32_1 = arith.constant 0 : i32
    return %arg0, %c0_i32, %c0_i32_0 : i32, i32, i32
  }
}

</mosaic_0001>

<bundles_post_ra>
// kernel: tpu_custom_call.1
= control target key start
LH: loop header
LB: loop body
LE: loop exit
PB: predicated region body
PF: predicated region fallthrough
CT: control target
= control target key end

     0   :  { %12 = vsyncpa [#allocation7], 0  ;;  %s1366_s0 = inlined_call_operand.vmem [shape: f32[2], index: 0, kind: input, shape index: {}]   ;;  %s1367_s1 = inlined_call_operand.vmem [shape: f32[8,128], index: 1, kind: input, shape index: {}]   ;;  %s1368_s2 = inlined_call_operand.vmem [shape: f32[2,128,8], index: 2, kind: input, shape index: {}]   ;;  %s1369_s3 = inlined_call_operand.vmem [shape: s32[2,1,8], index: 3, kind: input, shape index: {}]   ;;  %s1370_s4 = inlined_call_operand.vmem [shape: s32[2,8,1], index: 4, kind: input, shape index: {}]   ;;  %s1371_s5 = inlined_call_operand.vmem [shape: f32[8,1], index: 5, kind: input, shape index: {}]   ;;  %s1372_s6 = inlined_call_operand.vmem [shape: f32[8,128], index: 6, kind: input, shape index: {}]   ;;  %s1373_s7 = inlined_call_operand.hbm [shape: f32[2,8,128], index: 7, kind: output, shape index: {}]  }
   0x1   :  { %13 = vsyncpa [#allocation6], 0 }
   0x2   :  { %15 = vsyncpa [#allocation6 + $0x1], 0  ;;  %s1145_s24 = smov 0   ;;  %s1147_s25 = smov 0  }
   0x3   :  { %s1149_s26 = smov 0   ;;  %s1151_s27 = smov 0  }
   0x4   :  { %s1153_s28 = smov 0   ;;  %s1155_s29 = smov 0  }
   0x5 LB: > { %s839_s30 = sadd.s32 4294967295, %s1097_s29   ;;  %s840_s8 = sadd.s32 4294967294, %s1097_s29   ;;  %s1097_s29 = sphi %s1155_s29, %s21_s29   ;;  %s1093_s28 = sphi %s1153_s28, %s1382_s28   ;;  %s1089_s27 = sphi %s1151_s27, %s1381_s27   ;;  %s1085_s26 = sphi %s1149_s26, %s1380_s26   ;;  %s1081_s25 = sphi %s1147_s25, %s1379_s25   ;;  %s1077_s24 = sphi %s1145_s24, %s1378_s24  }
   0x6   : > { %s33_s9 = sadd.s32 1, %s1093_s28  ;;  %s223_s10 = sadd.s32 1, %s1085_s26 }
   0x7   : > { %p35_p0 = scmp.ge.s32.totalorder %s33_s9, 2  ;;  %p233_p1 = scmp.ne.s32.totalorder %s1085_s26, %s1081_s25 }
   0x8   : > { %p234_p2 = scmp.eq.s32.totalorder %s839_s30, 1  ;;  %p239_p3 = scmp.ne.s32.totalorder %s1081_s25, %s1077_s24 }
   0x9   : > { %s1384_s9 = smov (%p35_p0, %s33_s9), 0  ;;  %p240_p5 = scmp.eq.s32.totalorder %s840_s8, 1 }
   0xa   : > { %p1185_p4 = por %p234_p2, %p233_p1  ;;  %s220_s12 = ssub.s32 %s1093_s28, %s1384_s9 }
   0xb   : > { %p841_p6 = scmp.ge.s32.totalorder %s1097_s29, 1  ;;  %p221_p7 = scmp.eq.s32.totalorder %s220_s12, 0 }
   0xc   : > { %p1192_p8 = por %p240_p5, %p239_p3  ;;  %p247_p9 = scmp.lt.s32.totalorder %s1097_s29, 3 }
   0xd   : > { %s1198_s14 = scalar_select %p221_p7, %s1085_s26, %s223_s10  }
   0xe   : > { %p1200_p10 = pnand %p841_p6, %p247_p9  ;;  %p1204_p11 = scmp.eq.s32.totalorder %s839_s30, 0 }
   0xf   : > { %s260_s19 = sshll.u32 %s1366_s0, 4  ;;  %s261_s19 = int_to_ptr.vmem [resolvable:$true] %s260_s19 }
  0x10   : > { %p919_p12 = pneg %p1200_p10  ;;  %s1002_s20 = scalar_lea.vmem %s261_s19, 16 }
  0x11   : > { %p1003_p0 = scmp.ne.s32.totalorder %s261_s19, %s1002_s20  ;;  %p1010_p5 = scmp.lt.s32.totalorder %s261_s19, %s261_s19 }
  0x12   : > { %p920_p13 = pnand %p1204_p11, %p919_p12  ;;  %p1011_p6 = scmp.lt.s32.totalorder %s1002_s20, %s1002_s20 }
  0x14   : > { %p1004_p1 = pneg %p920_p13  ;;  %p1012_p7 = por %p1011_p6, %p1010_p5 }
  0x16   : > { %p1005_p2 = pnand %p1004_p1, %p1003_p0 }
  0x18   : > { %p1006_p3 = pneg %p1005_p2 }
  0x1a   : > { %p1013_p9 = pnand %p1012_p7, %p1006_p3 }
  0x1c   : > { %1016 = shalt.err (!%p1013_p9)
}
  0x1d   : > { %s1099_s21 = smov [#allocation5]   ;;  %322 = sbr.rel (%p1200_p10) target bundleno = 1068 (0x42c), region = 48 }
  0x1e   : > { %922 = dma.vmem_to_smem (!%p920_p13), %s261_s19, 16, %s1099_s21, [#allocation7]  }
  0x22   : > { %1068 = dma.done.wait (%p1204_p11), [#allocation7], 16  }
  0x23   : > { %1070 = vsyncadd (%p1204_p11), [#allocation7], 4294967280 }
  0x24   : > { %328 = sfence }
  0x25   : > { %s376_s22 = sand.u32 1, %s1081_s25   ;;  %p383_p12 = scmp.lt.s32.totalorder %s1089_s27, 1  ;;  %v1226_v0 = vld [vmem:[%s1367_s1] sm:$0xff]  ;;  %v1100_v1 = vmov 0.0   ;;  %vm1101_vm0 = vmmov 0   ;;  %v1102_v3 = vmov 0   ;;  %v584_v36 = vlaneseq }
  0x26   : > { %s1230_s8 = sshll.u32 %s376_s22, 3  ;;  %878 = vmatprep.subr.mxu0 %v1100_v1  ;;  %910 = vmatprep.mubr.msk.f32.mxu0 %vm1101_vm0, %v1100_v1  ;;  %v421_v2 = vmul.f32 %v1226_v0, %v1226_v0  ;;  %vm416_vm1 = vcmask 57344   ;;  %v1103_v21 = vmov -1e+30   ;;  %s419_s23 = sld [smem:[#allocation5 + %s1089_s27]]  ;;  %vm515_vm2 = vcmask 64512  }
  0x27   : > { %983 = vset.pattern.permute.xlu1 %v1102_v3  ;;  %984 = vset.pattern.permute.xlu0 %v1102_v3  ;;  %s1239_s10 = scalar_select %p383_p12, %s1089_s27, 1  ;;  %417 = vst.msk [vmem:[#allocation3] sm:$0x1] %vm416_vm1, %v1103_v21  ;;  %418 = vst.msk [vmem:[#allocation4] sm:$0x1] %vm416_vm1, %v1100_v1  ;;  %v585_v40 = vshrl.u32 %v584_v36, 7 }
  0x28   : > { %422 = vadd.xlane.f32.xlu0 %v421_v2  ;;  %vm414_vm4 = vcmask 3072   ;;  %vm563_vm5 = vcmask 1040384   ;;  %vm566_vm6 = vcmask 1024   ;;  %p855_p10 = scmp.ne.s32.totalorder %s1089_s27, 0 }
  0x29   : > { %s860_s12 = sshll.u32 %s1239_s10, 7  ;;  %s852_s18 = sshll.u32 %s1239_s10, 3  ;;  %v586_v45 = vsub.s32 0, %v585_v40  ;;  %415 = vst.msk [vmem:[#allocation2] sm:$0xf] %vm414_vm4, %v1100_v1 }
  0x2a   : > { %s1245_s17 = scalar_lea.vmem %s1368_s2, %s860_s12  ;;  %s397_s21 = scalar_lea.vmem %s1370_s4, %s852_s18 }
  0x2b   : > { %v443_v4 = vld [vmem:[%s1245_s17 + $0x78] sm:$0xff]  ;;  %v442_v5 = vld [vmem:[%s1245_s17 + $0x70] sm:$0xff]  ;;  %v441_v6 = vld [vmem:[%s1245_s17 + $0x68] sm:$0xff]  ;;  %s390_s15 = scalar_lea.vmem %s1369_s3, %s1239_s10  ;;  %s378_s10 = scalar_lea.vmem [#allocation8], %s1230_s8 }
  0x2c   : > { %879 = vmatpush3.msra.mxu0 %v443_v4  ;;  %v440_v7 = vld [vmem:[%s1245_s17 + $0x60] sm:$0xff]  ;;  %v439_v9 = vld [vmem:[%s1245_s17 + $0x58] sm:$0xff]  ;;  %v438_v10 = vld [vmem:[%s1245_s17 + $0x50] sm:$0xff]  ;;  %v426_v25 = vstv %s419_s23 }
  0x2d   : > { %880 = vmatprep.subr.mxu0 %v1100_v1  ;;  %v528_v8 = vld [vmem:[%s397_s21] sm:$0xff]  ;;  %v437_v11 = vld [vmem:[%s1245_s17 + $0x48] sm:$0xff]  ;;  %v435_v13 = vld [vmem:[%s1245_s17 + $0x38] sm:$0xff] }
  0x2e   : > { %881 = vmatpush3.msra.mxu0 %v442_v5  ;;  %531 = vperm.xlu1 %983, %v528_v8   ;;  %v436_v12 = vld [vmem:[%s1245_s17 + $0x40] sm:$0xff]  ;;  %v434_v14 = vld [vmem:[%s1245_s17 + $0x30] sm:$0xff]  ;;  %v433_v15 = vld [vmem:[%s1245_s17 + $0x28] sm:$0xff] }
  0x2f   : > { %882 = vmatprep.subr.mxu0 %v1100_v1  ;;  %v432_v16 = vld [vmem:[%s1245_s17 + $0x20] sm:$0xff]  ;;  %v431_v17 = vld [vmem:[%s1245_s17 + $0x18] sm:$0xff]  ;;  %v430_v18 = vld [vmem:[%s1245_s17 + $0x10] sm:$0xff] }
  0x30   : > { %883 = vmatpush3.msra.mxu0 %v441_v6  ;;  %v429_v19 = vld [vmem:[%s1245_s17 + $0x8] sm:$0xff]  ;;  %v428_v20 = vld [vmem:[%s1245_s17] sm:$0xff] }
  0x31   : > { %884 = vmatprep.subr.mxu0 %v1100_v1  ;;  %v853_v28 = vld [vmem:[%s390_s15] ss:$0 sm:$0xff]  ;;  %v568_v44 = vld [vmem:[#allocation3] sm:$0x1]  ;;  %v569_v60 = vld [vmem:[#allocation4] sm:$0x1] }
  0x32   : > { %885 = vmatpush3.msra.mxu0 %v440_v7 }
  0x33   : > { %886 = vmatprep.subr.mxu0 %v1100_v1 }
  0x34   : > { %887 = vmatpush3.msra.mxu0 %v439_v9 }
  0x35   : > { %888 = vmatprep.subr.mxu0 %v1100_v1 }
  0x36   : > { %889 = vmatpush3.msra.mxu0 %v438_v10 }
  0x37   : > { %890 = vmatprep.subr.mxu0 %v1100_v1 }
  0x38   : > { %891 = vmatpush3.msra.mxu0 %v437_v11 }
  0x39   : > { %892 = vmatprep.subr.mxu0 %v1100_v1 }
  0x3a   : > { %893 = vmatpush3.msra.mxu0 %v436_v12 }
  0x3b   : > { %894 = vmatprep.subr.mxu0 %v1100_v1 }
  0x3c   : > { %895 = vmatpush3.msra.mxu0 %v435_v13 }
  0x3d   : > { %896 = vmatprep.subr.mxu0 %v1100_v1 }
  0x3e   : > { %897 = vmatpush3.msra.mxu0 %v434_v14 }
  0x3f   : > { %898 = vmatprep.subr.mxu0 %v1100_v1 }
  0x40   : > { %899 = vmatpush3.msra.mxu0 %v433_v15 }
  0x41   : > { %900 = vmatprep.subr.mxu0 %v1100_v1 }
  0x42   : > { %901 = vmatpush3.msra.mxu0 %v432_v16 }
  0x43   : > { %902 = vmatprep.subr.mxu0 %v1100_v1 }
  0x44   : > { %903 = vmatpush3.msra.mxu0 %v431_v17 }
  0x45   : > { %904 = vmatprep.subr.mxu0 %v1100_v1 }
  0x46   : > { %905 = vmatpush3.msra.mxu0 %v430_v18 }
  0x47   : > { %906 = vmatprep.subr.mxu0 %v1100_v1 }
  0x48   : > { %907 = vmatpush3.msra.mxu0 %v429_v19 }
  0x49   : > { %908 = vmatprep.subr.mxu0 %v1100_v1 }
  0x4a   : > { %909 = vmatpush3.msra.mxu0 %v428_v20 }
  0x4b   : > { %911 = vmatmul.mubr.f32.vlgmr.msra.gmra.mxu0 %v1226_v0 }
  0xa9   : > { %v532_v27 = vpop.permute.xlu1 %531 }
  0xaa   : > { %vm537_vm3 = vcmp.eq.s32.totalorder %v532_v27, %v853_v28  ;;  %v550_v28 = vld [vmem:[#allocation2] sm:$0x3] }
  0xab   : > { %v854_v32 = vsel %vm537_vm3, 1.0, %v1100_v1 }
  0xac   : > { %v540_v35 = vsel %vm515_vm2, %v854_v32, 0.0 }
  0xb1   : > { %v423_v22 = vpop.xlane.xlu0 %422 }
  0xb2   : > { %v424_v23 = vmax.f32 %v423_v22, 1e-24 }
  0xb4   : > { %985 = vrsqrt.f32 %v424_v23 }
  0xc1   : > { %v986_v24 = vpop.eup %985 }
  0xc2   : > { %v427_v26 = vmul.f32 %v986_v24, %v426_v25 }
 0x10b   : > { %v510_v29 = vpop.f32.mrf.mxu0 }
 0x10c   : > { %v514_v30 = vmul.f32 %v510_v29, %v427_v26 }
 0x10d   : > { %v912_v31 = vpop.f32.mrf.mxu0 }
 0x10e   : > { %v516_v33 = vsel %vm515_vm2, %v514_v30, -inf  ;;  %v543_v39 = vsel %vm537_vm3, %v514_v30, 0.0 }
 0x10f   : > { %517 = vmax.xlane.f32.xlu0 %v516_v33  ;;  %v570_v34 = vrot.slane %v516_v33, 4  ;;  %v544_v42 = vsel %vm515_vm2, %v543_v39, 0.0 }
 0x111   : > { %v571_v37 = vmax.f32 %v516_v33, %v570_v34 }
 0x113   : > { %v572_v38 = vrot.slane %v571_v37, 2  ;;  %541 = vadd.xlane.f32.xlu0 %v540_v35 }
 0x115   : > { %v573_v41 = vmax.f32 %v571_v37, %v572_v38 }
 0x117   : > { %v574_v43 = vrot.slane %v573_v41, 1  ;;  %545 = vadd.xlane.f32.xlu0 %v544_v42 }
 0x119   : > { %v575_v46 = vmax.f32 %v573_v41, %v574_v43 }
 0x11b   : > { %v576_v47 = vmax.f32 %v568_v44, %v575_v46 }
 0x11d   : > { %578 = vst.msk [vmem:[#allocation3] sm:$0x1] %vm416_vm1, %v576_v47  ;;  %v587_v48 = vrot.slane %v576_v47, %v586_v45  ;;  %v579_v51 = vsub.f32 %v568_v44, %v576_v47 }
 0x11f   : > { %v589_v49 = vsub.f32 %v514_v30, %v587_v48  ;;  %v580_v52 = vmul.f32 1.442695, %v579_v51 }
 0x121   : > { %v590_v50 = vmul.f32 1.442695, %v589_v49 }
 0x123   : > { %987 = vpow2.f32 %v590_v50 }
 0x124   : > { %989 = vpow2.f32 %v580_v52 }
 0x130   : > { %v988_v53 = vpop.eup %987 }
 0x131   : > { %v592_v54 = vsel %vm515_vm2, %v988_v53, 0.0  ;;  %v990_v59 = vpop.eup %989 }
 0x132   : > { %v593_v55 = vrot.slane %v592_v54, 4  ;;  %v582_v62 = vmul.f32 %v990_v59, %v569_v60 }
 0x134   : > { %v594_v56 = vadd.f32 %v593_v55, %v592_v54 }
 0x136   : > { %v595_v57 = vrot.slane %v594_v56, 2 }
 0x138   : > { %v596_v58 = vadd.f32 %v595_v57, %v594_v56 }
 0x13a   : > { %v597_v61 = vrot.slane %v596_v58, 1 }
 0x13c   : > { %v598_v63 = vadd.f32 %v597_v61, %v596_v58 }
 0x13e   : > { %v599_v2 = vadd.f32 %v598_v63, %v582_v62 }
 0x140   : > { %600 = vst.msk [vmem:[#allocation4] sm:$0x1] %vm416_vm1, %v599_v2 }
 0x198   : > { %v518_v4 = vpop.xlane.xlu0 %517 }
 0x199   : > { %v519_v5 = vsub.f32 %v514_v30, %v518_v4 }
 0x19b   : > { %v520_v6 = vmul.f32 1.442695, %v519_v5 }
 0x19c   : > { %v542_v9 = vpop.xlane.xlu0 %541 }
 0x19d   : > { %991 = vpow2.f32 %v520_v6  ;;  %v547_v10 = vmax.f32 %v542_v9, 1.0 }
 0x19f   : > { %993 = vrcp.f32 %v547_v10 }
 0x1a0   : > { %v546_v1 = vpop.xlane.xlu0 %545 }
 0x1aa   : > { %v992_v7 = vpop.eup %991 }
 0x1ab   : > { %v522_v8 = vsel %vm515_vm2, %v992_v7, 0.0 }
 0x1ac   : > { %523 = vadd.xlane.f32.xlu1 %v522_v8  ;;  %v994_v12 = vpop.eup %993 }
 0x1ad   : > { %v549_v13 = vmul.f32 %v994_v12, %v546_v1 }
 0x1af   : > { %v557_v14 = vrot.slane %v549_v13, 4 }
 0x1b1   : > { %v558_v15 = vadd.f32 %v557_v14, %v549_v13 }
 0x1b3   : > { %v559_v18 = vrot.slane %v558_v15, 2 }
 0x1b5   : > { %v560_v21 = vadd.f32 %v559_v18, %v558_v15 }
 0x1b7   : > { %v561_v24 = vrot.slane %v560_v21, 1 }
 0x1b9   : > { %v562_v27 = vadd.f32 %v561_v24, %v560_v21 }
 0x235   : > { %v524_v11 = vpop.xlane.xlu1 %523 }
 0x236   : > { %995 = vlog2.f32 %v524_v11 }
 0x243   : > { %v996_v16 = vpop.eup %995 }
 0x244   : > { %v526_v17 = vmul.f32 0.6931472, %v996_v16 }
 0x246   : > { %v527_v19 = vadd.f32 %v526_v17, %v518_v4 }
 0x248   : > { %v551_v20 = vrot.slane %v527_v19, 4 }
 0x24a   : > { %v552_v22 = vadd.f32 %v551_v20, %v527_v19 }
 0x24c   : > { %v553_v23 = vrot.slane %v552_v22, 2 }
 0x24e   : > { %v554_v25 = vadd.f32 %v553_v23, %v552_v22 }
 0x250   : > { %v555_v26 = vrot.slane %v554_v25, 1 }
 0x252   : > { %v556_v29 = vadd.f32 %v555_v26, %v554_v25 }
 0x253   : > { %604 = sbr.rel (%p855_p10) target bundleno = 764 (0x2fc), region = 60 }
 0x254   : > { %v564_v30 = vsel %vm563_vm5, %v556_v29, %v562_v27 }
 0x255   : > { %v565_v31 = vadd.f32 %v564_v30, %v550_v28 }
 0x257   : > { %567 = vst.msk [vmem:[#allocation2] sm:$0x3] %vm566_vm6, %v565_v31 }
 0x258   : > { %v605_v32 = vld [vmem:[%s1372_s6] sm:$0xff]  ;;  %vm615_vm7 = vcmask 7168  }
 0x259   : > { %v606_v33 = vsub.f32 %v1226_v0, %v605_v32  ;;  %v612_v35 = vld [vmem:[%s1371_s5] sm:$0xff] }
 0x25a   : > { %v623_v36 = vsel %vm615_vm7, %v612_v35, 0.0  ;;  %v613_v51 = vld [vmem:[#allocation2 + $0x2] sm:$0x3] }
 0x25b   : > { %v607_v34 = vmul.f32 %v606_v33, %v606_v33  ;;  %v624_v37 = vrot.slane %v623_v36, 4 }
 0x25d   : > { %608 = vadd.xlane.f32.xlu0 %v607_v34  ;;  %v625_v38 = vadd.f32 %v624_v37, %v623_v36 }
 0x25f   : > { %v626_v41 = vrot.slane %v625_v38, 2 }
 0x261   : > { %v627_v45 = vadd.f32 %v626_v41, %v625_v38 }
 0x263   : > { %v628_v0 = vrot.slane %v627_v45, 1 }
 0x265   : > { %v629_v50 = vadd.f32 %v628_v0, %v627_v45 }
 0x2e6   : > { %v609_v39 = vpop.xlane.xlu0 %608 }
 0x2e7   : > { %v611_v40 = vmul.f32 0.0078125, %v609_v39 }
 0x2e9   : > { %v614_v42 = vmul.f32 %v612_v35, %v611_v40 }
 0x2eb   : > { %v616_v43 = vsel %vm615_vm7, %v614_v42, 0.0 }
 0x2ec   : > { %v617_v44 = vrot.slane %v616_v43, 4 }
 0x2ee   : > { %v618_v46 = vadd.f32 %v617_v44, %v616_v43 }
 0x2f0   : > { %v619_v47 = vrot.slane %v618_v46, 2 }
 0x2f2   : > { %v620_v48 = vadd.f32 %v619_v47, %v618_v46 }
 0x2f4   : > { %v621_v49 = vrot.slane %v620_v48, 1 }
 0x2f6   : > { %v622_v52 = vadd.f32 %v621_v49, %v620_v48 }
 0x2f8   : > { %v630_v53 = vsel %vm563_vm5, %v622_v52, %v629_v50 }
 0x2f9   : > { %v631_v54 = vadd.f32 %v630_v53, %v613_v51 }
 0x2fb   : > { %632 = vst.msk [vmem:[#allocation2 + $0x2] sm:$0x3] %vm566_vm6, %v631_v54 }
 0x2fc PF: > { %v637_v55 = vld [vmem:[#allocation4] sm:$0x1]  ;;  %997 = vset.pattern.permute.xlu0 %v1102_v3  ;;  %v636_v57 = vld [vmem:[#allocation3] sm:$0x1]  ;;  %vm664_vm9 = vcmask 1041408   ;;  %vm666_vm10 = vcmask 1042432  }
 0x2fd   : > { %998 = vlog2.f32 %v637_v55  ;;  %s857_s20 = sshll.u32 %s1089_s27, 7  ;;  %s688_s21 = sshll.u32 %s378_s10, 4  ;;  %s689_s21 = int_to_ptr.vmem [resolvable:$true] %s688_s21 }
 0x2fe   : > { %s1322_s12 = scalar_lea.hbm %s1373_s7, %s857_s20  ;;  %s675_s15 = scalar_lea.sflag [#allocation6], %s376_s22 }
 0x2ff   : > { %s1017_s16 = scalar_lea.vmem %s689_s21, 128  ;;  %s1104_s17 = smov [#allocation8]  }
 0x300   : > { %p1018_p11 = scmp.ne.s32.totalorder %s689_s21, %s1017_s16  ;;  %s1021_s27 = sshll.u32 %s1104_s17, 4  ;;  %s1022_s27 = int_to_ptr.vmem [resolvable:$false] %s1021_s27 }
 0x301   : > { %s1023_s18 = scalar_lea.vmem %s1022_s27, 256  ;;  %p1024_p1 = scmp.lt.s32.totalorder %s689_s21, %s1022_s27 }
 0x302   : > { %v651_v61 = vld [vmem:[#allocation2 + $0x3] sm:$0x1]  ;;  %v650_v2 = vld [vmem:[#allocation2 + $0x2] sm:$0x1]  ;;  %v645_v4 = vld [vmem:[#allocation2 + $0x1] sm:$0x1]  ;;  %p1019_p13 = pnand %p1018_p11, %p1185_p4  ;;  %p1025_p2 = scmp.lt.s32.totalorder %s1023_s18, %s1017_s16 }
 0x303   : > { %v653_v62 = vmax.f32 %v651_v61, 1.0  ;;  %vm652_vm8 = vcmp.gt.f32.partialorder %v651_v61, 0.0  ;;  %v644_v6 = vld [vmem:[#allocation2] sm:$0x1]  ;;  %v647_v3 = vmul.f32 2.0, %v645_v4  ;;  %v661_v12 = vrot.slane %v651_v61, 6 }
 0x304   : > { %p1020_p0 = pneg %p1019_p13  ;;  %p1026_p3 = por %p1025_p2, %p1024_p1 }
 0x305   : > { %1000 = vrcp.f32 %v653_v62 }
 0x306   : > { %p1027_p5 = pnand %p1026_p3, %p1020_p0 }
 0x30a   : > { %v999_v56 = vpop.eup %998 }
 0x30b   : > { %v639_v58 = vmul.f32 0.6931472, %v999_v56 }
 0x30d   : > { %v640_v59 = vadd.f32 %v639_v58, %v636_v57 }
 0x30f   : > { %v641_v60 = vsel %vm416_vm1, %v640_v59, 0.0 }
 0x310   : > { %642 = vadd.xlane.f32.xlu0 %v641_v60 }
 0x312   : > { %v1001_v63 = vpop.eup %1000 }
 0x313   : > { %v655_v5 = vmul.f32 %v1001_v63, %v650_v2 }
 0x315   : > { %v656_v8 = vsel %vm652_vm8, %v655_v5, 0.0 }
 0x316   : > { %v658_v11 = vrot.slane %v656_v8, 7 }
 0x399   : > { %v643_v7 = vpop.xlane.xlu0 %642 }
 0x39a   : > { %v646_v9 = vadd.f32 %v644_v6, %v643_v7 }
 0x39c   : > { %v648_v10 = vsub.f32 %v646_v9, %v647_v3 }
 0x39e   : > { %v649_v1 = vmul.f32 0.0625, %v648_v10 }
 0x3a0   : > { %v663_v13 = vsel %vm563_vm5, %v649_v1, %v658_v11 }
 0x3a1   : > { %v665_v14 = vsel %vm664_vm9, %v663_v13, %v661_v12 }
 0x3a2   : > { %v667_v15 = vsel %vm666_vm10, %v665_v14, 0.0 }
 0x3a3   : > { %670 = vperm.xlu0 %997, %v667_v15  }
 0x41e   : > { %v671_v16 = vpop.permute.xlu0 %670 }
 0x41f   : > { %673 = vst [vmem:[%s378_s10] sm:$0xff] %v671_v16 }
 0x420   : > { %1030 = shalt.err (!%p1027_p5)
}
 0x421   : > { %s1031_s8 = scalar_lea.hbm %s1322_s12, 128  ;;  %s1035_s19 = scalar_lea.hbm %s1373_s7, 256 }
 0x422   : > { %p1032_p6 = scmp.ne.s32.totalorder %s1322_s12, %s1031_s8  ;;  %p1036_p12 = scmp.lt.s32.totalorder %s1322_s12, %s1373_s7 }
 0x423   : > { %p1037_p10 = scmp.lt.s32.totalorder %s1035_s19, %s1031_s8 }
 0x424   : > { %p1033_p7 = pnand %p1032_p6, %p1185_p4 }
 0x425   : > { %p1038_p11 = por %p1037_p10, %p1036_p12 }
 0x426   : > { %p1034_p9 = pneg %p1033_p7 }
 0x428   : > { %p1039_p13 = pnand %p1038_p11, %p1034_p9 }
 0x42a   : > { %1042 = shalt.err (!%p1039_p13)
}
 0x42b   : > { %917 = dma.vmem_to_hbm [thread:$0]  (%p1185_p4), %s689_s21, 128, %s1322_s12, %s675_s15  }
 0x42c PF: > { %p929_p0 = scmp.ge.s32.totalorder %s1097_s29, 2  ;;  %s700_s30 = sand.u32 1, %s1077_s24  }
 0x42d   : > { %s701_s16 = scalar_lea.sflag [#allocation6], %s700_s30 }
 0x42e   : > { %p924_p1 = pnand %p929_p0, %p1192_p8 }
 0x430   : > { %p925_p2 = pneg %p924_p1 }
 0x432   : > { %1072 = dma.done.wait (%p925_p2), %s701_s16, 128  }
 0x433   : > { %1074 = vsyncadd (%p925_p2), %s701_s16, 4294967168  ;;  %s21_s29 = sadd.s32 1, %s1097_s29   ;;  %s1378_s24 = smov %s1081_s25 }
 0x434   : > { %p18_p3 = scmp.ge.s32.totalorder %s21_s29, 4   ;;  %s1379_s25 = smov %s1085_s26 }
 0x435   : > { %s1380_s26 = smov %s1198_s14  ;;  %s1381_s27 = smov %s1093_s28 }
 0x436   : > { %s1382_s28 = smov %s1384_s9  ;;  %20 = sbr.rel (!%p18_p3) target bundleno = 5 (0x5), region = 115 }
 0x43b   :  { %706 = vsyncpa [#allocation6], 1 }
 0x43c   :  { %708 = vsyncpa [#allocation6 + $0x1], 1 }
 0x43d   :  { %709 = vsyncpa [#allocation7], 1 }
 0x43e   :  { %711 = vsyncpa [#allocation7 + $0x1], 1 }

// kernel: tpu_custom_call.1
= control target key start
LH: loop header
LB: loop body
LE: loop exit
PB: predicated region body
PF: predicated region fallthrough
CT: control target
= control target key end

     0   :  { %12 = vsyncpa [#allocation7], 0  ;;  %s1360_s0 = inlined_call_operand.vmem [shape: f32[2], index: 0, kind: input, shape index: {}]   ;;  %s1361_s1 = inlined_call_operand.vmem [shape: f32[8,128], index: 1, kind: input, shape index: {}]   ;;  %s1362_s2 = inlined_call_operand.vmem [shape: f32[2,128,8], index: 2, kind: input, shape index: {}]   ;;  %s1363_s3 = inlined_call_operand.vmem [shape: s32[2,1,8], index: 3, kind: input, shape index: {}]   ;;  %s1364_s4 = inlined_call_operand.vmem [shape: s32[2,8,1], index: 4, kind: input, shape index: {}]   ;;  %s1365_s5 = inlined_call_operand.vmem [shape: f32[8,1], index: 5, kind: input, shape index: {}]   ;;  %s1366_s6 = inlined_call_operand.vmem [shape: f32[8,128], index: 6, kind: input, shape index: {}]   ;;  %s1367_s7 = inlined_call_operand.hbm [shape: f32[2,8,128], index: 7, kind: output, shape index: {}]  }
   0x1   :  { %13 = vsyncpa [#allocation6], 0 }
   0x2   :  { %15 = vsyncpa [#allocation6 + $0x1], 0  ;;  %s1139_s24 = smov 0   ;;  %s1141_s25 = smov 0  }
   0x3   :  { %s1143_s26 = smov 0   ;;  %s1145_s27 = smov 0  }
   0x4   :  { %s1147_s28 = smov 0   ;;  %s1149_s29 = smov 0  }
   0x5 LB: > { %s833_s30 = sadd.s32 4294967295, %s1091_s29   ;;  %s834_s8 = sadd.s32 4294967294, %s1091_s29   ;;  %s1091_s29 = sphi %s1149_s29, %s21_s29   ;;  %s1087_s28 = sphi %s1147_s28, %s1376_s28   ;;  %s1083_s27 = sphi %s1145_s27, %s1375_s27   ;;  %s1079_s26 = sphi %s1143_s26, %s1374_s26   ;;  %s1075_s25 = sphi %s1141_s25, %s1373_s25   ;;  %s1071_s24 = sphi %s1139_s24, %s1372_s24  }
   0x6   : > { %s33_s9 = sadd.s32 1, %s1087_s28  ;;  %s223_s10 = sadd.s32 1, %s1079_s26 }
   0x7   : > { %p35_p0 = scmp.ge.s32.totalorder %s33_s9, 2  ;;  %p233_p1 = scmp.ne.s32.totalorder %s1079_s26, %s1075_s25 }
   0x8   : > { %p234_p2 = scmp.eq.s32.totalorder %s833_s30, 1  ;;  %p239_p3 = scmp.ne.s32.totalorder %s1075_s25, %s1071_s24 }
   0x9   : > { %s1378_s9 = smov (%p35_p0, %s33_s9), 0  ;;  %p240_p5 = scmp.eq.s32.totalorder %s834_s8, 1 }
   0xa   : > { %p1179_p4 = por %p234_p2, %p233_p1  ;;  %s220_s12 = ssub.s32 %s1087_s28, %s1378_s9 }
   0xb   : > { %p835_p6 = scmp.ge.s32.totalorder %s1091_s29, 1  ;;  %p221_p7 = scmp.eq.s32.totalorder %s220_s12, 0 }
   0xc   : > { %p1186_p8 = por %p240_p5, %p239_p3  ;;  %p247_p9 = scmp.lt.s32.totalorder %s1091_s29, 3 }
   0xd   : > { %s1192_s14 = scalar_select %p221_p7, %s1079_s26, %s223_s10  }
   0xe   : > { %p1194_p10 = pnand %p835_p6, %p247_p9  ;;  %p1198_p11 = scmp.eq.s32.totalorder %s833_s30, 0 }
   0xf   : > { %s260_s19 = sshll.u32 %s1360_s0, 4  ;;  %s261_s19 = int_to_ptr.vmem [resolvable:$true] %s260_s19 }
  0x10   : > { %p913_p12 = pneg %p1194_p10  ;;  %s996_s20 = scalar_lea.vmem %s261_s19, 16 }
  0x11   : > { %p997_p0 = scmp.ne.s32.totalorder %s261_s19, %s996_s20  ;;  %p1004_p5 = scmp.lt.s32.totalorder %s261_s19, %s261_s19 }
  0x12   : > { %p914_p13 = pnand %p1198_p11, %p913_p12  ;;  %p1005_p6 = scmp.lt.s32.totalorder %s996_s20, %s996_s20 }
  0x14   : > { %p998_p1 = pneg %p914_p13  ;;  %p1006_p7 = por %p1005_p6, %p1004_p5 }
  0x16   : > { %p999_p2 = pnand %p998_p1, %p997_p0 }
  0x18   : > { %p1000_p3 = pneg %p999_p2 }
  0x1a   : > { %p1007_p9 = pnand %p1006_p7, %p1000_p3 }
  0x1c   : > { %1010 = shalt.err (!%p1007_p9)
}
  0x1d   : > { %s1093_s21 = smov [#allocation5]   ;;  %322 = sbr.rel (%p1194_p10) target bundleno = 1068 (0x42c), region = 48 }
  0x1e   : > { %916 = dma.vmem_to_smem (!%p914_p13), %s261_s19, 16, %s1093_s21, [#allocation7]  }
  0x22   : > { %1062 = dma.done.wait (%p1198_p11), [#allocation7], 16  }
  0x23   : > { %1064 = vsyncadd (%p1198_p11), [#allocation7], 4294967280 }
  0x24   : > { %328 = sfence }
  0x25   : > { %s376_s22 = sand.u32 1, %s1075_s25   ;;  %p383_p12 = scmp.lt.s32.totalorder %s1083_s27, 1  ;;  %v1220_v0 = vld [vmem:[%s1361_s1] sm:$0xff]  ;;  %v1094_v1 = vmov 0.0   ;;  %vm1095_vm0 = vmmov 0   ;;  %v1096_v3 = vmov 0   ;;  %v584_v36 = vlaneseq }
  0x26   : > { %s1224_s8 = sshll.u32 %s376_s22, 3  ;;  %872 = vmatprep.subr.mxu0 %v1094_v1  ;;  %904 = vmatprep.mubr.msk.f32.mxu0 %vm1095_vm0, %v1094_v1  ;;  %v421_v2 = vmul.f32 %v1220_v0, %v1220_v0  ;;  %vm416_vm1 = vcmask 57344   ;;  %v1097_v21 = vmov -1e+30   ;;  %s419_s23 = sld [smem:[#allocation5 + %s1083_s27]]  ;;  %vm515_vm2 = vcmask 64512  }
  0x27   : > { %977 = vset.pattern.permute.xlu1 %v1096_v3  ;;  %978 = vset.pattern.permute.xlu0 %v1096_v3  ;;  %s1233_s10 = scalar_select %p383_p12, %s1083_s27, 1  ;;  %417 = vst.msk [vmem:[#allocation3] sm:$0x1] %vm416_vm1, %v1097_v21  ;;  %418 = vst.msk [vmem:[#allocation4] sm:$0x1] %vm416_vm1, %v1094_v1  ;;  %v585_v40 = vshrl.u32 %v584_v36, 7 }
  0x28   : > { %422 = vadd.xlane.f32.xlu0 %v421_v2  ;;  %vm414_vm4 = vcmask 3072   ;;  %vm563_vm5 = vcmask 1040384   ;;  %vm566_vm6 = vcmask 1024   ;;  %p849_p10 = scmp.ne.s32.totalorder %s1083_s27, 0 }
  0x29   : > { %s854_s12 = sshll.u32 %s1233_s10, 7  ;;  %s846_s18 = sshll.u32 %s1233_s10, 3  ;;  %v586_v45 = vsub.s32 0, %v585_v40  ;;  %415 = vst.msk [vmem:[#allocation2] sm:$0xf] %vm414_vm4, %v1094_v1 }
  0x2a   : > { %s1239_s17 = scalar_lea.vmem %s1362_s2, %s854_s12  ;;  %s397_s21 = scalar_lea.vmem %s1364_s4, %s846_s18 }
  0x2b   : > { %v443_v4 = vld [vmem:[%s1239_s17 + $0x78] sm:$0xff]  ;;  %v442_v5 = vld [vmem:[%s1239_s17 + $0x70] sm:$0xff]  ;;  %v441_v6 = vld [vmem:[%s1239_s17 + $0x68] sm:$0xff]  ;;  %s390_s15 = scalar_lea.vmem %s1363_s3, %s1233_s10  ;;  %s378_s10 = scalar_lea.vmem [#allocation8], %s1224_s8 }
  0x2c   : > { %873 = vmatpush3.msra.mxu0 %v443_v4  ;;  %v440_v7 = vld [vmem:[%s1239_s17 + $0x60] sm:$0xff]  ;;  %v439_v9 = vld [vmem:[%s1239_s17 + $0x58] sm:$0xff]  ;;  %v438_v10 = vld [vmem:[%s1239_s17 + $0x50] sm:$0xff]  ;;  %v426_v25 = vstv %s419_s23 }
  0x2d   : > { %874 = vmatprep.subr.mxu0 %v1094_v1  ;;  %v528_v8 = vld [vmem:[%s397_s21] sm:$0xff]  ;;  %v437_v11 = vld [vmem:[%s1239_s17 + $0x48] sm:$0xff]  ;;  %v435_v13 = vld [vmem:[%s1239_s17 + $0x38] sm:$0xff] }
  0x2e   : > { %875 = vmatpush3.msra.mxu0 %v442_v5  ;;  %531 = vperm.xlu1 %977, %v528_v8   ;;  %v436_v12 = vld [vmem:[%s1239_s17 + $0x40] sm:$0xff]  ;;  %v434_v14 = vld [vmem:[%s1239_s17 + $0x30] sm:$0xff]  ;;  %v433_v15 = vld [vmem:[%s1239_s17 + $0x28] sm:$0xff] }
  0x2f   : > { %876 = vmatprep.subr.mxu0 %v1094_v1  ;;  %v432_v16 = vld [vmem:[%s1239_s17 + $0x20] sm:$0xff]  ;;  %v431_v17 = vld [vmem:[%s1239_s17 + $0x18] sm:$0xff]  ;;  %v430_v18 = vld [vmem:[%s1239_s17 + $0x10] sm:$0xff] }
  0x30   : > { %877 = vmatpush3.msra.mxu0 %v441_v6  ;;  %v429_v19 = vld [vmem:[%s1239_s17 + $0x8] sm:$0xff]  ;;  %v428_v20 = vld [vmem:[%s1239_s17] sm:$0xff] }
  0x31   : > { %878 = vmatprep.subr.mxu0 %v1094_v1  ;;  %v847_v28 = vld [vmem:[%s390_s15] ss:$0 sm:$0xff]  ;;  %v568_v44 = vld [vmem:[#allocation3] sm:$0x1]  ;;  %v569_v60 = vld [vmem:[#allocation4] sm:$0x1] }
  0x32   : > { %879 = vmatpush3.msra.mxu0 %v440_v7 }
  0x33   : > { %880 = vmatprep.subr.mxu0 %v1094_v1 }
  0x34   : > { %881 = vmatpush3.msra.mxu0 %v439_v9 }
  0x35   : > { %882 = vmatprep.subr.mxu0 %v1094_v1 }
  0x36   : > { %883 = vmatpush3.msra.mxu0 %v438_v10 }
  0x37   : > { %884 = vmatprep.subr.mxu0 %v1094_v1 }
  0x38   : > { %885 = vmatpush3.msra.mxu0 %v437_v11 }
  0x39   : > { %886 = vmatprep.subr.mxu0 %v1094_v1 }
  0x3a   : > { %887 = vmatpush3.msra.mxu0 %v436_v12 }
  0x3b   : > { %888 = vmatprep.subr.mxu0 %v1094_v1 }
  0x3c   : > { %889 = vmatpush3.msra.mxu0 %v435_v13 }
  0x3d   : > { %890 = vmatprep.subr.mxu0 %v1094_v1 }
  0x3e   : > { %891 = vmatpush3.msra.mxu0 %v434_v14 }
  0x3f   : > { %892 = vmatprep.subr.mxu0 %v1094_v1 }
  0x40   : > { %893 = vmatpush3.msra.mxu0 %v433_v15 }
  0x41   : > { %894 = vmatprep.subr.mxu0 %v1094_v1 }
  0x42   : > { %895 = vmatpush3.msra.mxu0 %v432_v16 }
  0x43   : > { %896 = vmatprep.subr.mxu0 %v1094_v1 }
  0x44   : > { %897 = vmatpush3.msra.mxu0 %v431_v17 }
  0x45   : > { %898 = vmatprep.subr.mxu0 %v1094_v1 }
  0x46   : > { %899 = vmatpush3.msra.mxu0 %v430_v18 }
  0x47   : > { %900 = vmatprep.subr.mxu0 %v1094_v1 }
  0x48   : > { %901 = vmatpush3.msra.mxu0 %v429_v19 }
  0x49   : > { %902 = vmatprep.subr.mxu0 %v1094_v1 }
  0x4a   : > { %903 = vmatpush3.msra.mxu0 %v428_v20 }
  0x4b   : > { %905 = vmatmul.mubr.f32.vlgmr.msra.gmra.mxu0 %v1220_v0 }
  0xa9   : > { %v532_v27 = vpop.permute.xlu1 %531 }
  0xaa   : > { %vm537_vm3 = vcmp.eq.s32.totalorder %v532_v27, %v847_v28  ;;  %v550_v28 = vld [vmem:[#allocation2] sm:$0x3] }
  0xab   : > { %v848_v32 = vsel %vm537_vm3, 1.0, %v1094_v1 }
  0xac   : > { %v540_v35 = vsel %vm515_vm2, %v848_v32, 0.0 }
  0xb1   : > { %v423_v22 = vpop.xlane.xlu0 %422 }
  0xb2   : > { %v424_v23 = vmax.f32 %v423_v22, 1e-24 }
  0xb4   : > { %979 = vrsqrt.f32 %v424_v23 }
  0xc1   : > { %v980_v24 = vpop.eup %979 }
  0xc2   : > { %v427_v26 = vmul.f32 %v980_v24, %v426_v25 }
 0x10b   : > { %v510_v29 = vpop.f32.mrf.mxu0 }
 0x10c   : > { %v514_v30 = vmul.f32 %v510_v29, %v427_v26 }
 0x10d   : > { %v906_v31 = vpop.f32.mrf.mxu0 }
 0x10e   : > { %v516_v33 = vsel %vm515_vm2, %v514_v30, -inf  ;;  %v543_v39 = vsel %vm537_vm3, %v514_v30, 0.0 }
 0x10f   : > { %517 = vmax.xlane.f32.xlu0 %v516_v33  ;;  %v570_v34 = vrot.slane %v516_v33, 4  ;;  %v544_v42 = vsel %vm515_vm2, %v543_v39, 0.0 }
 0x111   : > { %v571_v37 = vmax.f32 %v516_v33, %v570_v34 }
 0x113   : > { %v572_v38 = vrot.slane %v571_v37, 2  ;;  %541 = vadd.xlane.f32.xlu0 %v540_v35 }
 0x115   : > { %v573_v41 = vmax.f32 %v571_v37, %v572_v38 }
 0x117   : > { %v574_v43 = vrot.slane %v573_v41, 1  ;;  %545 = vadd.xlane.f32.xlu0 %v544_v42 }
 0x119   : > { %v575_v46 = vmax.f32 %v573_v41, %v574_v43 }
 0x11b   : > { %v576_v47 = vmax.f32 %v568_v44, %v575_v46 }
 0x11d   : > { %578 = vst.msk [vmem:[#allocation3] sm:$0x1] %vm416_vm1, %v576_v47  ;;  %v587_v48 = vrot.slane %v576_v47, %v586_v45  ;;  %v579_v51 = vsub.f32 %v568_v44, %v576_v47 }
 0x11f   : > { %v589_v49 = vsub.f32 %v514_v30, %v587_v48  ;;  %v580_v52 = vmul.f32 1.442695, %v579_v51 }
 0x121   : > { %v590_v50 = vmul.f32 1.442695, %v589_v49 }
 0x123   : > { %981 = vpow2.f32 %v590_v50 }
 0x124   : > { %983 = vpow2.f32 %v580_v52 }
 0x130   : > { %v982_v53 = vpop.eup %981 }
 0x131   : > { %v592_v54 = vsel %vm515_vm2, %v982_v53, 0.0  ;;  %v984_v59 = vpop.eup %983 }
 0x132   : > { %v593_v55 = vrot.slane %v592_v54, 4  ;;  %v582_v62 = vmul.f32 %v984_v59, %v569_v60 }
 0x134   : > { %v594_v56 = vadd.f32 %v593_v55, %v592_v54 }
 0x136   : > { %v595_v57 = vrot.slane %v594_v56, 2 }
 0x138   : > { %v596_v58 = vadd.f32 %v595_v57, %v594_v56 }
 0x13a   : > { %v597_v61 = vrot.slane %v596_v58, 1 }
 0x13c   : > { %v598_v63 = vadd.f32 %v597_v61, %v596_v58 }
 0x13e   : > { %v599_v2 = vadd.f32 %v598_v63, %v582_v62 }
 0x140   : > { %600 = vst.msk [vmem:[#allocation4] sm:$0x1] %vm416_vm1, %v599_v2 }
 0x198   : > { %v518_v4 = vpop.xlane.xlu0 %517 }
 0x199   : > { %v519_v5 = vsub.f32 %v514_v30, %v518_v4 }
 0x19b   : > { %v520_v6 = vmul.f32 1.442695, %v519_v5 }
 0x19c   : > { %v542_v9 = vpop.xlane.xlu0 %541 }
 0x19d   : > { %985 = vpow2.f32 %v520_v6  ;;  %v547_v10 = vmax.f32 %v542_v9, 1.0 }
 0x19f   : > { %987 = vrcp.f32 %v547_v10 }
 0x1a0   : > { %v546_v1 = vpop.xlane.xlu0 %545 }
 0x1aa   : > { %v986_v7 = vpop.eup %985 }
 0x1ab   : > { %v522_v8 = vsel %vm515_vm2, %v986_v7, 0.0 }
 0x1ac   : > { %523 = vadd.xlane.f32.xlu1 %v522_v8  ;;  %v988_v12 = vpop.eup %987 }
 0x1ad   : > { %v549_v13 = vmul.f32 %v988_v12, %v546_v1 }
 0x1af   : > { %v557_v14 = vrot.slane %v549_v13, 4 }
 0x1b1   : > { %v558_v15 = vadd.f32 %v557_v14, %v549_v13 }
 0x1b3   : > { %v559_v18 = vrot.slane %v558_v15, 2 }
 0x1b5   : > { %v560_v21 = vadd.f32 %v559_v18, %v558_v15 }
 0x1b7   : > { %v561_v24 = vrot.slane %v560_v21, 1 }
 0x1b9   : > { %v562_v27 = vadd.f32 %v561_v24, %v560_v21 }
 0x235   : > { %v524_v11 = vpop.xlane.xlu1 %523 }
 0x236   : > { %989 = vlog2.f32 %v524_v11 }
 0x243   : > { %v990_v16 = vpop.eup %989 }
 0x244   : > { %v526_v17 = vmul.f32 0.6931472, %v990_v16 }
 0x246   : > { %v527_v19 = vadd.f32 %v526_v17, %v518_v4 }
 0x248   : > { %v551_v20 = vrot.slane %v527_v19, 4 }
 0x24a   : > { %v552_v22 = vadd.f32 %v551_v20, %v527_v19 }
 0x24c   : > { %v553_v23 = vrot.slane %v552_v22, 2 }
 0x24e   : > { %v554_v25 = vadd.f32 %v553_v23, %v552_v22 }
 0x250   : > { %v555_v26 = vrot.slane %v554_v25, 1 }
 0x252   : > { %v556_v29 = vadd.f32 %v555_v26, %v554_v25 }
 0x253   : > { %604 = sbr.rel (%p849_p10) target bundleno = 764 (0x2fc), region = 60 }
 0x254   : > { %v564_v30 = vsel %vm563_vm5, %v556_v29, %v562_v27 }
 0x255   : > { %v565_v31 = vadd.f32 %v564_v30, %v550_v28 }
 0x257   : > { %567 = vst.msk [vmem:[#allocation2] sm:$0x3] %vm566_vm6, %v565_v31 }
 0x258   : > { %v605_v32 = vld [vmem:[%s1366_s6] sm:$0xff]  ;;  %vm615_vm7 = vcmask 7168  }
 0x259   : > { %v606_v33 = vsub.f32 %v1220_v0, %v605_v32  ;;  %v612_v35 = vld [vmem:[%s1365_s5] sm:$0xff] }
 0x25a   : > { %v623_v36 = vsel %vm615_vm7, %v612_v35, 0.0  ;;  %v613_v51 = vld [vmem:[#allocation2 + $0x2] sm:$0x3] }
 0x25b   : > { %v607_v34 = vmul.f32 %v606_v33, %v606_v33  ;;  %v624_v37 = vrot.slane %v623_v36, 4 }
 0x25d   : > { %608 = vadd.xlane.f32.xlu0 %v607_v34  ;;  %v625_v38 = vadd.f32 %v624_v37, %v623_v36 }
 0x25f   : > { %v626_v41 = vrot.slane %v625_v38, 2 }
 0x261   : > { %v627_v45 = vadd.f32 %v626_v41, %v625_v38 }
 0x263   : > { %v628_v0 = vrot.slane %v627_v45, 1 }
 0x265   : > { %v629_v50 = vadd.f32 %v628_v0, %v627_v45 }
 0x2e6   : > { %v609_v39 = vpop.xlane.xlu0 %608 }
 0x2e7   : > { %v611_v40 = vmul.f32 0.0078125, %v609_v39 }
 0x2e9   : > { %v614_v42 = vmul.f32 %v612_v35, %v611_v40 }
 0x2eb   : > { %v616_v43 = vsel %vm615_vm7, %v614_v42, 0.0 }
 0x2ec   : > { %v617_v44 = vrot.slane %v616_v43, 4 }
 0x2ee   : > { %v618_v46 = vadd.f32 %v617_v44, %v616_v43 }
 0x2f0   : > { %v619_v47 = vrot.slane %v618_v46, 2 }
 0x2f2   : > { %v620_v48 = vadd.f32 %v619_v47, %v618_v46 }
 0x2f4   : > { %v621_v49 = vrot.slane %v620_v48, 1 }
 0x2f6   : > { %v622_v52 = vadd.f32 %v621_v49, %v620_v48 }
 0x2f8   : > { %v630_v53 = vsel %vm563_vm5, %v622_v52, %v629_v50 }
 0x2f9   : > { %v631_v54 = vadd.f32 %v630_v53, %v613_v51 }
 0x2fb   : > { %632 = vst.msk [vmem:[#allocation2 + $0x2] sm:$0x3] %vm566_vm6, %v631_v54 }
 0x2fc PF: > { %v637_v55 = vld [vmem:[#allocation4] sm:$0x1]  ;;  %991 = vset.pattern.permute.xlu0 %v1096_v3  ;;  %v636_v57 = vld [vmem:[#allocation3] sm:$0x1]  ;;  %vm664_vm9 = vcmask 1041408   ;;  %vm666_vm10 = vcmask 1042432  }
 0x2fd   : > { %992 = vlog2.f32 %v637_v55  ;;  %s851_s20 = sshll.u32 %s1083_s27, 7  ;;  %s688_s21 = sshll.u32 %s378_s10, 4  ;;  %s689_s21 = int_to_ptr.vmem [resolvable:$true] %s688_s21 }
 0x2fe   : > { %s1316_s12 = scalar_lea.hbm %s1367_s7, %s851_s20  ;;  %s675_s15 = scalar_lea.sflag [#allocation6], %s376_s22 }
 0x2ff   : > { %s1011_s16 = scalar_lea.vmem %s689_s21, 128  ;;  %s1098_s17 = smov [#allocation8]  }
 0x300   : > { %p1012_p11 = scmp.ne.s32.totalorder %s689_s21, %s1011_s16  ;;  %s1015_s27 = sshll.u32 %s1098_s17, 4  ;;  %s1016_s27 = int_to_ptr.vmem [resolvable:$false] %s1015_s27 }
 0x301   : > { %s1017_s18 = scalar_lea.vmem %s1016_s27, 256  ;;  %p1018_p1 = scmp.lt.s32.totalorder %s689_s21, %s1016_s27 }
 0x302   : > { %v651_v61 = vld [vmem:[#allocation2 + $0x3] sm:$0x1]  ;;  %v650_v2 = vld [vmem:[#allocation2 + $0x2] sm:$0x1]  ;;  %v645_v4 = vld [vmem:[#allocation2 + $0x1] sm:$0x1]  ;;  %p1013_p13 = pnand %p1012_p11, %p1179_p4  ;;  %p1019_p2 = scmp.lt.s32.totalorder %s1017_s18, %s1011_s16 }
 0x303   : > { %v653_v62 = vmax.f32 %v651_v61, 1.0  ;;  %vm652_vm8 = vcmp.gt.f32.partialorder %v651_v61, 0.0  ;;  %v644_v6 = vld [vmem:[#allocation2] sm:$0x1]  ;;  %v647_v3 = vmul.f32 2.0, %v645_v4  ;;  %v661_v12 = vrot.slane %v651_v61, 6 }
 0x304   : > { %p1014_p0 = pneg %p1013_p13  ;;  %p1020_p3 = por %p1019_p2, %p1018_p1 }
 0x305   : > { %994 = vrcp.f32 %v653_v62 }
 0x306   : > { %p1021_p5 = pnand %p1020_p3, %p1014_p0 }
 0x30a   : > { %v993_v56 = vpop.eup %992 }
 0x30b   : > { %v639_v58 = vmul.f32 0.6931472, %v993_v56 }
 0x30d   : > { %v640_v59 = vadd.f32 %v639_v58, %v636_v57 }
 0x30f   : > { %v641_v60 = vsel %vm416_vm1, %v640_v59, 0.0 }
 0x310   : > { %642 = vadd.xlane.f32.xlu0 %v641_v60 }
 0x312   : > { %v995_v63 = vpop.eup %994 }
 0x313   : > { %v655_v5 = vmul.f32 %v995_v63, %v650_v2 }
 0x315   : > { %v656_v8 = vsel %vm652_vm8, %v655_v5, 0.0 }
 0x316   : > { %v658_v11 = vrot.slane %v656_v8, 7 }
 0x399   : > { %v643_v7 = vpop.xlane.xlu0 %642 }
 0x39a   : > { %v646_v9 = vadd.f32 %v644_v6, %v643_v7 }
 0x39c   : > { %v648_v10 = vsub.f32 %v646_v9, %v647_v3 }
 0x39e   : > { %v649_v1 = vmul.f32 0.0625, %v648_v10 }
 0x3a0   : > { %v663_v13 = vsel %vm563_vm5, %v649_v1, %v658_v11 }
 0x3a1   : > { %v665_v14 = vsel %vm664_vm9, %v663_v13, %v661_v12 }
 0x3a2   : > { %v667_v15 = vsel %vm666_vm10, %v665_v14, 0.0 }
 0x3a3   : > { %670 = vperm.xlu0 %991, %v667_v15  }
 0x41e   : > { %v671_v16 = vpop.permute.xlu0 %670 }
 0x41f   : > { %673 = vst [vmem:[%s378_s10] sm:$0xff] %v671_v16 }
 0x420   : > { %1024 = shalt.err (!%p1021_p5)
}
 0x421   : > { %s1025_s8 = scalar_lea.hbm %s1316_s12, 128  ;;  %s1029_s19 = scalar_lea.hbm %s1367_s7, 256 }
 0x422   : > { %p1026_p6 = scmp.ne.s32.totalorder %s1316_s12, %s1025_s8  ;;  %p1030_p12 = scmp.lt.s32.totalorder %s1316_s12, %s1367_s7 }
 0x423   : > { %p1031_p10 = scmp.lt.s32.totalorder %s1029_s19, %s1025_s8 }
 0x424   : > { %p1027_p7 = pnand %p1026_p6, %p1179_p4 }
 0x425   : > { %p1032_p11 = por %p1031_p10, %p1030_p12 }
 0x426   : > { %p1028_p9 = pneg %p1027_p7 }
 0x428   : > { %p1033_p13 = pnand %p1032_p11, %p1028_p9 }
 0x42a   : > { %1036 = shalt.err (!%p1033_p13)
}
 0x42b   : > { %911 = dma.vmem_to_hbm [thread:$0]  (%p1179_p4), %s689_s21, 128, %s1316_s12, %s675_s15  }
 0x42c PF: > { %p923_p0 = scmp.ge.s32.totalorder %s1091_s29, 2  ;;  %s700_s30 = sand.u32 1, %s1071_s24  }
 0x42d   : > { %s701_s16 = scalar_lea.sflag [#allocation6], %s700_s30 }
 0x42e   : > { %p918_p1 = pnand %p923_p0, %p1186_p8 }
 0x430   : > { %p919_p2 = pneg %p918_p1 }
 0x432   : > { %1066 = dma.done.wait (%p919_p2), %s701_s16, 128  }
 0x433   : > { %1068 = vsyncadd (%p919_p2), %s701_s16, 4294967168  ;;  %s21_s29 = sadd.s32 1, %s1091_s29   ;;  %s1372_s24 = smov %s1075_s25 }
 0x434   : > { %p18_p3 = scmp.ge.s32.totalorder %s21_s29, 4   ;;  %s1373_s25 = smov %s1079_s26 }
 0x435   : > { %s1374_s26 = smov %s1192_s14  ;;  %s1375_s27 = smov %s1087_s28 }
 0x436   : > { %s1376_s28 = smov %s1378_s9  ;;  %20 = sbr.rel (!%p18_p3) target bundleno = 5 (0x5), region = 115 }
 0x43b   :  { %706 = vsyncpa [#allocation6], 1 }
 0x43c   :  { %708 = vsyncpa [#allocation6 + $0x1], 1 }
 0x43d   :  { %709 = vsyncpa [#allocation7], 1 }
 0x43e   :  { %711 = vsyncpa [#allocation7 + $0x1], 1 }

</bundles_post_ra>
